<compile_context>
chip_gen: v7x
topology: tpu7x:2x2x1
jax: 0.10.0
libtpu: 0.0.40
codegen_flags: <defaults>
</compile_context>

<pallas_src>
import math
import functools

import jax
import jax.numpy as jnp
from jax import lax
from jax.experimental import pallas as pl
from jax.experimental.pallas import tpu as pltpu

EPS = 1e-5  # torch.nn.LayerNorm default eps


def _ln(x):
    """LayerNorm over the last axis, no affine."""
    mu = jnp.mean(x, axis=-1, keepdims=True)
    var = jnp.mean((x - mu) ** 2, axis=-1, keepdims=True)
    return (x - mu) * lax.rsqrt(var + EPS)


def _erf(x):
    # Abramowitz & Stegun 7.1.26 polynomial (|err| <= 1.5e-7): matches torch's
    # erf-based GELU to f32 tolerance using only VPU/EUP-lowerable ops.
    a1, a2, a3, a4, a5 = 0.254829592, -0.284496736, 1.421413741, -1.453152027, 1.061405429
    p = 0.3275911
    sgn = jnp.where(x >= 0.0, 1.0, -1.0)
    ax = jnp.abs(x)
    t = 1.0 / (1.0 + p * ax)
    poly = ((((a5 * t + a4) * t + a3) * t + a2) * t + a1) * t
    return sgn * (1.0 - poly * jnp.exp(-ax * ax))


def _gelu(x):
    return 0.5 * x * (1.0 + _erf(x * 0.7071067811865476))


# ------------------------- fully fused decoder layer -------------------------
def decoder_layer_kernel(x_ref, ctx_ref,
                         wq_ref, bq_ref, wkv_ref, bkv_ref,
                         wo_ref, bo_ref, gamma_ref, beta_ref,
                         w1_ref, w2_ref, o_ref,
                         *, num_heads, ctx_len, scale):
    f32 = jnp.float32
    L, B, H = x_ref.shape
    Lc = ctx_len
    S = Lc + L
    nH = num_heads
    hd = H // nH
    FF = w2_ref.shape[0]

    x3 = x_ref[...].astype(f32)      # [L, B, H] (seq-major, as given by the caller)
    c3 = ctx_ref[...].astype(f32)    # [Lc, B, H]

    # Fold batch into matmul rows, (b, l) row order.
    x_rows = jnp.concatenate([x3[:, b, :] for b in range(B)], axis=0)       # [B*L, H]

    # ---- self_layer_norm_pre (no affine) ----
    q_ln = _ln(x_rows)                                                      # [B*L, H]

    # ---- key = value = cat([context, query], dim=0)  (per batch) ----
    kv_rows = jnp.concatenate(
        [jnp.concatenate([c3[:, b, :], q_ln[b * L:(b + 1) * L, :]], axis=0)
         for b in range(B)],
        axis=0)                                                             # [B*S, H]

    # ---- in_proj: two wide MXU matmuls (Q from query rows only; K|V packed) ----
    q_all = jnp.dot(q_ln, wq_ref[...].astype(f32),
                    preferred_element_type=f32) + bq_ref[...].astype(f32)   # [B*L, H]
    kv_all = jnp.dot(kv_rows, wkv_ref[...].astype(f32),
                     preferred_element_type=f32) + bkv_ref[...].astype(f32)  # [B*S, 2H]
    k_all = kv_all[:, :H]                                                   # [B*S, H]
    v_all = kv_all[:, H:]                                                   # [B*S, H]

    # ---- per-(batch, head) views via static sublane/lane slices ----
    def split_heads(mat, rows):
        return jnp.stack(
            [mat[b * rows:(b + 1) * rows, h * hd:(h + 1) * hd]
             for b in range(B) for h in range(nH)], axis=0)                 # [B*nH, rows, hd]

    qh = split_heads(q_all, L)   # [B*nH, L, hd]
    kh = split_heads(k_all, S)   # [B*nH, S, hd]
    vh = split_heads(v_all, S)   # [B*nH, S, hd]

    # additive attention mask: context fully visible, causal over the query block
    # TODO(synk): an arbitrary caller-provided attn_mask would need to be passed
    # back in as a kernel input; the static causal mask is generated in-kernel.
    qi = lax.broadcasted_iota(jnp.int32, (L, S), 0)
    kj = lax.broadcasted_iota(jnp.int32, (L, S), 1)
    mask = jnp.where((kj >= Lc) & ((kj - Lc) > qi), -1e9, 0.0).astype(f32)  # [L, S]

    # ---- scaled dot-product attention, batched over B*nH ----
    s = lax.dot_general(qh, kh,
                        dimension_numbers=(((2,), (2,)), ((0,), (0,))),
                        preferred_element_type=f32) * scale                 # [B*nH, L, S]
    s = s + mask[None, :, :]
    p = jnp.exp(s - jnp.max(s, axis=-1, keepdims=True))
    p = p / jnp.sum(p, axis=-1, keepdims=True)                              # exact softmax
    attn = lax.dot_general(p, vh,
                           dimension_numbers=(((2,), (1,)), ((0,), (0,))),
                           preferred_element_type=f32)                      # [B*nH, L, hd]

    # ---- head merge (lane concat) + single out_proj matmul ----
    attn_rows = jnp.concatenate(
        [jnp.concatenate([attn[b * nH + h] for h in range(nH)], axis=-1)
         for b in range(B)],
        axis=0)                                                             # [B*L, H]
    y = jnp.dot(attn_rows, wo_ref[...].astype(f32),
                preferred_element_type=f32) + bo_ref[...].astype(f32)       # [B*L, H]

    # ---- self_layer_norm_post (affine) + residual ----
    y = _ln(y) * gamma_ref[...].astype(f32) + beta_ref[...].astype(f32)
    x1 = x_rows + y                                                         # [B*L, H]

    # ---- self_ff_layer_norm_pre + FeedForward + residual ----
    h1 = _ln(x1)
    ff = jnp.dot(h1, w1_ref[...].astype(f32), preferred_element_type=f32)   # [B*L, 2*FF]
    a = ff[:, :FF]                                                          # "x" chunk
    g = ff[:, FF:]                                                          # gate chunk
    m = _ln(a * _gelu(g))                                                   # FeedForward.layer_norm (no affine)
    y2 = jnp.dot(m, w2_ref[...].astype(f32), preferred_element_type=f32)    # [B*L, H]
    out_rows = x1 + y2                                                      # [B*L, H]

    # single full-block store back in seq-major [L, B, H] layout
    out3 = jnp.stack([out_rows[b * L:(b + 1) * L, :] for b in range(B)], axis=1)
    o_ref[...] = out3.astype(o_ref.dtype)


def decoder_layer(x, context, params, *, num_heads):
    """x: [L, B, H] seq-major, context: [Lc, B, H]. Returns [L, B, H]."""
    L, B, H = x.shape
    Lc = context.shape[0]
    hd = H // num_heads
    FF = params['w2'].shape[0]

    kernel = functools.partial(decoder_layer_kernel,
                               num_heads=num_heads, ctx_len=Lc,
                               scale=1.0 / math.sqrt(hd))

    return pl.pallas_call(
        kernel,
        out_shape=jax.ShapeDtypeStruct((L, B, H), x.dtype),
        grid=(1,),
        in_specs=[
            pl.BlockSpec((L, B, H), lambda i: (0, 0, 0)),     # x (seq-major, no wrapper transpose)
            pl.BlockSpec((Lc, B, H), lambda i: (0, 0, 0)),    # context
            pl.BlockSpec((H, H), lambda i: (0, 0)),           # w_q
            pl.BlockSpec((1, H), lambda i: (0, 0)),           # b_q
            pl.BlockSpec((H, 2 * H), lambda i: (0, 0)),       # w_kv (K|V packed along lanes)
            pl.BlockSpec((1, 2 * H), lambda i: (0, 0)),       # b_kv
            pl.BlockSpec((H, H), lambda i: (0, 0)),           # out_proj weight (transposed)
            pl.BlockSpec((1, H), lambda i: (0, 0)),           # out_proj bias
            pl.BlockSpec((1, H), lambda i: (0, 0)),           # post-LN gamma
            pl.BlockSpec((1, H), lambda i: (0, 0)),           # post-LN beta
            pl.BlockSpec((H, 2 * FF), lambda i: (0, 0)),      # linear_1 (x|gate packed, 128 lanes)
            pl.BlockSpec((FF, H), lambda i: (0, 0)),          # linear_2 (transposed)
        ],
        out_specs=pl.BlockSpec((L, B, H), lambda i: (0, 0, 0)),
        compiler_params=pltpu.CompilerParams(dimension_semantics=("arbitrary",)),
    )(x, context,
      params['w_q'], params['b_q'], params['w_kv'], params['b_kv'],
      params['w_o'], params['b_o'], params['gamma'], params['beta'],
      params['w1'], params['w2'])


if __name__ == "__main__":
    H, NUM_HEADS = 48, 4            # head_dim = 12
    L, LC, B = 8, 8, 2              # query len, context len, batch
    HD = H // NUM_HEADS
    FF = H * 4 // 3                 # 64 -> linear_1 out features = 128

    key = jax.random.PRNGKey(0)
    k0, k1, k2, k3, k4, k5 = jax.random.split(key, 6)
    std = math.sqrt(2.0 / (5.0 * H))

    def trunc_normal(k, shape):
        return (std * jax.random.truncated_normal(k, -2.0, 2.0, shape)).astype(jnp.float32)

    # torch-layout weights
    in_proj_w = trunc_normal(k0, (3 * H, H))         # MultiheadAttention.in_proj_weight [q;k;v]
    in_proj_b = jnp.zeros((3 * H,), jnp.float32)     # zeroed by module init (still honored)
    out_proj_w = trunc_normal(k1, (H, H))            # MultiheadAttention.out_proj.weight
    out_proj_b = jnp.zeros((H,), jnp.float32)        # zeroed by module init
    w1 = trunc_normal(k2, (2 * FF, H))               # FeedForward.linear_1.weight
    w2 = trunc_normal(k3, (H, FF))                   # FeedForward.linear_2.weight

    params = dict(
        w_q=in_proj_w[:H].T,                                           # [H, H]
        b_q=in_proj_b[:H].reshape(1, H),
        w_kv=jnp.concatenate([in_proj_w[H:2 * H].T,
                              in_proj_w[2 * H:].T], axis=1),           # [H, 2H] = [K | V]
        b_kv=in_proj_b[H:].reshape(1, 2 * H),
        w_o=out_proj_w.T,                                              # [H, H]
        b_o=out_proj_b.reshape(1, H),
        gamma=jnp.ones((1, H), jnp.float32),                           # self_layer_norm_post affine init
        beta=jnp.zeros((1, H), jnp.float32),
        w1=w1.T,                                                       # [H, 2*FF] = [x-chunk | gate]
        w2=w2.T,                                                       # [FF, H]
    )

    x = jax.random.normal(k4, (L, B, H), jnp.float32)
    context = jax.random.normal(k5, (LC, B, H), jnp.float32)

    out = decoder_layer(x, context, params, num_heads=NUM_HEADS)
    jax.block_until_ready(out)
    print("KERNEL_OK")
</pallas_src>

<mosaic_0001>
module attributes {stable_mosaic.version = 11 : i64} {
  func.func @decoder_layer_kernel(%arg0: i32, %arg1: memref<8x2x48xf32, #tpu.memory_space<vmem>>, %arg2: memref<8x2x48xf32, #tpu.memory_space<vmem>>, %arg3: memref<48x48xf32, #tpu.memory_space<vmem>>, %arg4: memref<1x48xf32, #tpu.memory_space<vmem>>, %arg5: memref<48x96xf32, #tpu.memory_space<vmem>>, %arg6: memref<1x96xf32, #tpu.memory_space<vmem>>, %arg7: memref<48x48xf32, #tpu.memory_space<vmem>>, %arg8: memref<1x48xf32, #tpu.memory_space<vmem>>, %arg9: memref<1x48xf32, #tpu.memory_space<vmem>>, %arg10: memref<1x48xf32, #tpu.memory_space<vmem>>, %arg11: memref<48x128xf32, #tpu.memory_space<vmem>>, %arg12: memref<64x48xf32, #tpu.memory_space<vmem>>, %arg13: memref<8x2x48xf32, #tpu.memory_space<vmem>>) attributes {dimension_semantics = [#tpu.dimension_semantics<arbitrary>], iteration_bounds = array<i64: 1>, scalar_prefetch = 0 : i64, scratch_operands = 0 : i64, tpu.core_type = #tpu.core_type<tc>, window_params = [{pipeline_mode = #tpu.pipeline_mode<synchronous>, transform_indices = @transform_0, window_bounds = array<i64: 8, 2, 48>}, {pipeline_mode = #tpu.pipeline_mode<synchronous>, transform_indices = @transform_1, window_bounds = array<i64: 8, 2, 48>}, {pipeline_mode = #tpu.pipeline_mode<synchronous>, transform_indices = @transform_2, window_bounds = array<i64: 48, 48>}, {pipeline_mode = #tpu.pipeline_mode<synchronous>, transform_indices = @transform_3, window_bounds = array<i64: 1, 48>}, {pipeline_mode = #tpu.pipeline_mode<synchronous>, transform_indices = @transform_4, window_bounds = array<i64: 48, 96>}, {pipeline_mode = #tpu.pipeline_mode<synchronous>, transform_indices = @transform_5, window_bounds = array<i64: 1, 96>}, {pipeline_mode = #tpu.pipeline_mode<synchronous>, transform_indices = @transform_6, window_bounds = array<i64: 48, 48>}, {pipeline_mode = #tpu.pipeline_mode<synchronous>, transform_indices = @transform_7, window_bounds = array<i64: 1, 48>}, {pipeline_mode = #tpu.pipeline_mode<synchronous>, transform_indices = @transform_8, window_bounds = array<i64: 1, 48>}, {pipeline_mode = #tpu.pipeline_mode<synchronous>, transform_indices = @transform_9, window_bounds = array<i64: 1, 48>}, {pipeline_mode = #tpu.pipeline_mode<synchronous>, transform_indices = @transform_10, window_bounds = array<i64: 48, 128>}, {pipeline_mode = #tpu.pipeline_mode<synchronous>, transform_indices = @transform_11, window_bounds = array<i64: 64, 48>}, {pipeline_mode = #tpu.pipeline_mode<synchronous>, transform_indices = @transform_12, window_bounds = array<i64: 8, 2, 48>}]} {
    %c0 = arith.constant 0 : index
    %c0_0 = arith.constant 0 : index
    %c0_1 = arith.constant 0 : index
    %0 = vector.load %arg1[%c0, %c0_0, %c0_1] : memref<8x2x48xf32, #tpu.memory_space<vmem>>, vector<8x2x48xf32>
    %c0_2 = arith.constant 0 : index
    %c0_3 = arith.constant 0 : index
    %c0_4 = arith.constant 0 : index
    %1 = vector.load %arg2[%c0_2, %c0_3, %c0_4] : memref<8x2x48xf32, #tpu.memory_space<vmem>>, vector<8x2x48xf32>
    %2 = vector.extract_strided_slice %0 {offsets = [0, 0, 0], sizes = [8, 1, 48], strides = [1, 1, 1]} : vector<8x2x48xf32> to vector<8x1x48xf32>
    %3 = vector.shape_cast %2 : vector<8x1x48xf32> to vector<8x48xf32>
    %4 = vector.extract_strided_slice %0 {offsets = [0, 1, 0], sizes = [8, 1, 48], strides = [1, 1, 1]} : vector<8x2x48xf32> to vector<8x1x48xf32>
    %5 = vector.shape_cast %4 : vector<8x1x48xf32> to vector<8x48xf32>
    %6 = tpu.concatenate %3, %5 in 0 : vector<8x48xf32>, vector<8x48xf32> -> vector<16x48xf32>
    %cst = arith.constant dense<0.000000e+00> : vector<16xf32>
    %7 = vector.multi_reduction <add>, %6, %cst [1] : vector<16x48xf32> to vector<16xf32>
    %8 = vector.shape_cast %7 : vector<16xf32> to vector<16x1xf32>
    %cst_5 = arith.constant 4.800000e+01 : f32
    %9 = vector.broadcast %cst_5 : f32 to vector<16x1xf32>
    %10 = arith.divf %8, %9 : vector<16x1xf32>
    %11 = vector.broadcast %10 : vector<16x1xf32> to vector<16x48xf32>
    %12 = arith.subf %6, %11 : vector<16x48xf32>
    %13 = arith.mulf %12, %12 : vector<16x48xf32>
    %cst_6 = arith.constant dense<0.000000e+00> : vector<16xf32>
    %14 = vector.multi_reduction <add>, %13, %cst_6 [1] : vector<16x48xf32> to vector<16xf32>
    %15 = vector.shape_cast %14 : vector<16xf32> to vector<16x1xf32>
    %cst_7 = arith.constant 4.800000e+01 : f32
    %16 = vector.broadcast %cst_7 : f32 to vector<16x1xf32>
    %17 = arith.divf %15, %16 : vector<16x1xf32>
    %18 = vector.broadcast %10 : vector<16x1xf32> to vector<16x48xf32>
    %19 = arith.subf %6, %18 : vector<16x48xf32>
    %cst_8 = arith.constant 9.99999974E-6 : f32
    %20 = vector.broadcast %cst_8 : f32 to vector<16x1xf32>
    %21 = arith.addf %17, %20 : vector<16x1xf32>
    %22 = math.rsqrt %21 : vector<16x1xf32>
    %23 = vector.broadcast %22 : vector<16x1xf32> to vector<16x48xf32>
    %24 = arith.mulf %19, %23 : vector<16x48xf32>
    %25 = vector.extract_strided_slice %1 {offsets = [0, 0, 0], sizes = [8, 1, 48], strides = [1, 1, 1]} : vector<8x2x48xf32> to vector<8x1x48xf32>
    %26 = vector.shape_cast %25 : vector<8x1x48xf32> to vector<8x48xf32>
    %27 = vector.extract_strided_slice %24 {offsets = [0, 0], sizes = [8, 48], strides = [1, 1]} : vector<16x48xf32> to vector<8x48xf32>
    %28 = tpu.concatenate %26, %27 in 0 : vector<8x48xf32>, vector<8x48xf32> -> vector<16x48xf32>
    %29 = vector.extract_strided_slice %1 {offsets = [0, 1, 0], sizes = [8, 1, 48], strides = [1, 1, 1]} : vector<8x2x48xf32> to vector<8x1x48xf32>
    %30 = vector.shape_cast %29 : vector<8x1x48xf32> to vector<8x48xf32>
    %31 = vector.extract_strided_slice %24 {offsets = [8, 0], sizes = [8, 48], strides = [1, 1]} : vector<16x48xf32> to vector<8x48xf32>
    %32 = tpu.concatenate %30, %31 in 0 : vector<8x48xf32>, vector<8x48xf32> -> vector<16x48xf32>
    %33 = tpu.concatenate %28, %32 in 0 : vector<16x48xf32>, vector<16x48xf32> -> vector<32x48xf32>
    %c0_9 = arith.constant 0 : index
    %c0_10 = arith.constant 0 : index
    %34 = vector.load %arg3[%c0_9, %c0_10] : memref<48x48xf32, #tpu.memory_space<vmem>>, vector<48x48xf32>
    %cst_11 = arith.constant dense<0.000000e+00> : vector<16x48xf32>
    %35 = tpu.matmul %24, %34, %cst_11 {dimension_numbers = #tpu.dot_dimension_numbers<[1], [0], [0], [1], [0, 0, 1, 1], [], []>} : vector<16x48xf32>, vector<48x48xf32>, vector<16x48xf32> -> vector<16x48xf32>
    %c0_12 = arith.constant 0 : index
    %c0_13 = arith.constant 0 : index
    %36 = vector.load %arg4[%c0_12, %c0_13] : memref<1x48xf32, #tpu.memory_space<vmem>>, vector<1x48xf32>
    %37 = vector.broadcast %36 : vector<1x48xf32> to vector<16x48xf32>
    %38 = arith.addf %35, %37 : vector<16x48xf32>
    %c0_14 = arith.constant 0 : index
    %c0_15 = arith.constant 0 : index
    %39 = vector.load %arg5[%c0_14, %c0_15] : memref<48x96xf32, #tpu.memory_space<vmem>>, vector<48x96xf32>
    %cst_16 = arith.constant dense<0.000000e+00> : vector<32x96xf32>
    %40 = tpu.matmul %33, %39, %cst_16 {dimension_numbers = #tpu.dot_dimension_numbers<[1], [0], [0], [1], [0, 0, 1, 1], [], []>} : vector<32x48xf32>, vector<48x96xf32>, vector<32x96xf32> -> vector<32x96xf32>
    %c0_17 = arith.constant 0 : index
    %c0_18 = arith.constant 0 : index
    %41 = vector.load %arg6[%c0_17, %c0_18] : memref<1x96xf32, #tpu.memory_space<vmem>>, vector<1x96xf32>
    %42 = vector.broadcast %41 : vector<1x96xf32> to vector<32x96xf32>
    %43 = arith.addf %40, %42 : vector<32x96xf32>
    %44 = vector.extract_strided_slice %43 {offsets = [0, 0], sizes = [32, 48], strides = [1, 1]} : vector<32x96xf32> to vector<32x48xf32>
    %45 = vector.extract_strided_slice %43 {offsets = [0, 48], sizes = [32, 48], strides = [1, 1]} : vector<32x96xf32> to vector<32x48xf32>
    %46 = vector.extract_strided_slice %38 {offsets = [0, 0], sizes = [8, 12], strides = [1, 1]} : vector<16x48xf32> to vector<8x12xf32>
    %47 = vector.extract_strided_slice %38 {offsets = [0, 12], sizes = [8, 12], strides = [1, 1]} : vector<16x48xf32> to vector<8x12xf32>
    %48 = vector.extract_strided_slice %38 {offsets = [0, 24], sizes = [8, 12], strides = [1, 1]} : vector<16x48xf32> to vector<8x12xf32>
    %49 = vector.extract_strided_slice %38 {offsets = [0, 36], sizes = [8, 12], strides = [1, 1]} : vector<16x48xf32> to vector<8x12xf32>
    %50 = vector.extract_strided_slice %38 {offsets = [8, 0], sizes = [8, 12], strides = [1, 1]} : vector<16x48xf32> to vector<8x12xf32>
    %51 = vector.extract_strided_slice %38 {offsets = [8, 12], sizes = [8, 12], strides = [1, 1]} : vector<16x48xf32> to vector<8x12xf32>
    %52 = vector.extract_strided_slice %38 {offsets = [8, 24], sizes = [8, 12], strides = [1, 1]} : vector<16x48xf32> to vector<8x12xf32>
    %53 = vector.extract_strided_slice %38 {offsets = [8, 36], sizes = [8, 12], strides = [1, 1]} : vector<16x48xf32> to vector<8x12xf32>
    %54 = vector.shape_cast %46 : vector<8x12xf32> to vector<1x8x12xf32>
    %55 = vector.shape_cast %47 : vector<8x12xf32> to vector<1x8x12xf32>
    %56 = vector.shape_cast %48 : vector<8x12xf32> to vector<1x8x12xf32>
    %57 = vector.shape_cast %49 : vector<8x12xf32> to vector<1x8x12xf32>
    %58 = vector.shape_cast %50 : vector<8x12xf32> to vector<1x8x12xf32>
    %59 = vector.shape_cast %51 : vector<8x12xf32> to vector<1x8x12xf32>
    %60 = vector.shape_cast %52 : vector<8x12xf32> to vector<1x8x12xf32>
    %61 = vector.shape_cast %53 : vector<8x12xf32> to vector<1x8x12xf32>
    %62 = tpu.concatenate %54, %55, %56, %57, %58, %59, %60, %61 in 0 : vector<1x8x12xf32>, vector<1x8x12xf32>, vector<1x8x12xf32>, vector<1x8x12xf32>, vector<1x8x12xf32>, vector<1x8x12xf32>, vector<1x8x12xf32>, vector<1x8x12xf32> -> vector<8x8x12xf32>
    %63 = vector.extract_strided_slice %44 {offsets = [0, 0], sizes = [16, 12], strides = [1, 1]} : vector<32x48xf32> to vector<16x12xf32>
    %64 = vector.extract_strided_slice %44 {offsets = [0, 12], sizes = [16, 12], strides = [1, 1]} : vector<32x48xf32> to vector<16x12xf32>
    %65 = vector.extract_strided_slice %44 {offsets = [0, 24], sizes = [16, 12], strides = [1, 1]} : vector<32x48xf32> to vector<16x12xf32>
    %66 = vector.extract_strided_slice %44 {offsets = [0, 36], sizes = [16, 12], strides = [1, 1]} : vector<32x48xf32> to vector<16x12xf32>
    %67 = vector.extract_strided_slice %44 {offsets = [16, 0], sizes = [16, 12], strides = [1, 1]} : vector<32x48xf32> to vector<16x12xf32>
    %68 = vector.extract_strided_slice %44 {offsets = [16, 12], sizes = [16, 12], strides = [1, 1]} : vector<32x48xf32> to vector<16x12xf32>
    %69 = vector.extract_strided_slice %44 {offsets = [16, 24], sizes = [16, 12], strides = [1, 1]} : vector<32x48xf32> to vector<16x12xf32>
    %70 = vector.extract_strided_slice %44 {offsets = [16, 36], sizes = [16, 12], strides = [1, 1]} : vector<32x48xf32> to vector<16x12xf32>
    %71 = vector.shape_cast %63 : vector<16x12xf32> to vector<1x16x12xf32>
    %72 = vector.shape_cast %64 : vector<16x12xf32> to vector<1x16x12xf32>
    %73 = vector.shape_cast %65 : vector<16x12xf32> to vector<1x16x12xf32>
    %74 = vector.shape_cast %66 : vector<16x12xf32> to vector<1x16x12xf32>
    %75 = vector.shape_cast %67 : vector<16x12xf32> to vector<1x16x12xf32>
    %76 = vector.shape_cast %68 : vector<16x12xf32> to vector<1x16x12xf32>
    %77 = vector.shape_cast %69 : vector<16x12xf32> to vector<1x16x12xf32>
    %78 = vector.shape_cast %70 : vector<16x12xf32> to vector<1x16x12xf32>
    %79 = tpu.concatenate %71, %72, %73, %74, %75, %76, %77, %78 in 0 : vector<1x16x12xf32>, vector<1x16x12xf32>, vector<1x16x12xf32>, vector<1x16x12xf32>, vector<1x16x12xf32>, vector<1x16x12xf32>, vector<1x16x12xf32>, vector<1x16x12xf32> -> vector<8x16x12xf32>
    %80 = vector.extract_strided_slice %45 {offsets = [0, 0], sizes = [16, 12], strides = [1, 1]} : vector<32x48xf32> to vector<16x12xf32>
    %81 = vector.extract_strided_slice %45 {offsets = [0, 12], sizes = [16, 12], strides = [1, 1]} : vector<32x48xf32> to vector<16x12xf32>
    %82 = vector.extract_strided_slice %45 {offsets = [0, 24], sizes = [16, 12], strides = [1, 1]} : vector<32x48xf32> to vector<16x12xf32>
    %83 = vector.extract_strided_slice %45 {offsets = [0, 36], sizes = [16, 12], strides = [1, 1]} : vector<32x48xf32> to vector<16x12xf32>
    %84 = vector.extract_strided_slice %45 {offsets = [16, 0], sizes = [16, 12], strides = [1, 1]} : vector<32x48xf32> to vector<16x12xf32>
    %85 = vector.extract_strided_slice %45 {offsets = [16, 12], sizes = [16, 12], strides = [1, 1]} : vector<32x48xf32> to vector<16x12xf32>
    %86 = vector.extract_strided_slice %45 {offsets = [16, 24], sizes = [16, 12], strides = [1, 1]} : vector<32x48xf32> to vector<16x12xf32>
    %87 = vector.extract_strided_slice %45 {offsets = [16, 36], sizes = [16, 12], strides = [1, 1]} : vector<32x48xf32> to vector<16x12xf32>
    %88 = vector.shape_cast %80 : vector<16x12xf32> to vector<1x16x12xf32>
    %89 = vector.shape_cast %81 : vector<16x12xf32> to vector<1x16x12xf32>
    %90 = vector.shape_cast %82 : vector<16x12xf32> to vector<1x16x12xf32>
    %91 = vector.shape_cast %83 : vector<16x12xf32> to vector<1x16x12xf32>
    %92 = vector.shape_cast %84 : vector<16x12xf32> to vector<1x16x12xf32>
    %93 = vector.shape_cast %85 : vector<16x12xf32> to vector<1x16x12xf32>
    %94 = vector.shape_cast %86 : vector<16x12xf32> to vector<1x16x12xf32>
    %95 = vector.shape_cast %87 : vector<16x12xf32> to vector<1x16x12xf32>
    %96 = tpu.concatenate %88, %89, %90, %91, %92, %93, %94, %95 in 0 : vector<1x16x12xf32>, vector<1x16x12xf32>, vector<1x16x12xf32>, vector<1x16x12xf32>, vector<1x16x12xf32>, vector<1x16x12xf32>, vector<1x16x12xf32>, vector<1x16x12xf32> -> vector<8x16x12xf32>
    %97 = tpu.iota {dimensions = array<i32: 0>} : vector<8x16xi32>
    %98 = tpu.iota {dimensions = array<i32: 1>} : vector<8x16xi32>
    %c8_i32 = arith.constant 8 : i32
    %99 = vector.broadcast %c8_i32 : i32 to vector<8x16xi32>
    %100 = arith.cmpi sge, %98, %99 : vector<8x16xi32>
    %c8_i32_19 = arith.constant 8 : i32
    %101 = vector.broadcast %c8_i32_19 : i32 to vector<8x16xi32>
    %102 = arith.subi %98, %101 : vector<8x16xi32>
    %103 = arith.cmpi sgt, %102, %97 : vector<8x16xi32>
    %104 = arith.andi %100, %103 : vector<8x16xi1>
    %cst_20 = arith.constant -1.000000e+09 : f32
    %cst_21 = arith.constant 0.000000e+00 : f32
    %105 = vector.broadcast %cst_20 : f32 to vector<8x16xf32>
    %106 = vector.broadcast %cst_21 : f32 to vector<8x16xf32>
    %107 = arith.select %104, %105, %106 : vector<8x16xi1>, vector<8x16xf32>
    %cst_22 = arith.constant dense<0.000000e+00> : vector<8x8x16xf32>
    %108 = tpu.matmul %62, %79, %cst_22 {dimension_numbers = #tpu.dot_dimension_numbers<[2], [2], [1], [1], [0, 0, 0, 1, 1, 1], [0], [0]>} : vector<8x8x12xf32>, vector<8x16x12xf32>, vector<8x8x16xf32> -> vector<8x8x16xf32>
    %cst_23 = arith.constant 0.288675129 : f32
    %109 = vector.broadcast %cst_23 : f32 to vector<8x8x16xf32>
    %110 = arith.mulf %108, %109 : vector<8x8x16xf32>
    %111 = vector.shape_cast %107 : vector<8x16xf32> to vector<1x8x16xf32>
    %112 = vector.broadcast %111 : vector<1x8x16xf32> to vector<8x8x16xf32>
    %113 = arith.addf %110, %112 : vector<8x8x16xf32>
    %cst_24 = arith.constant dense<0xFF800000> : vector<8x8xf32>
    %114 = vector.multi_reduction <maximumf>, %113, %cst_24 [2] : vector<8x8x16xf32> to vector<8x8xf32>
    %115 = vector.shape_cast %114 : vector<8x8xf32> to vector<8x8x1xf32>
    %116 = vector.broadcast %115 : vector<8x8x1xf32> to vector<8x8x16xf32>
    %117 = arith.subf %113, %116 : vector<8x8x16xf32>
    %118 = math.exp %117 : vector<8x8x16xf32>
    %cst_25 = arith.constant dense<0.000000e+00> : vector<8x8xf32>
    %119 = vector.multi_reduction <add>, %118, %cst_25 [2] : vector<8x8x16xf32> to vector<8x8xf32>
    %120 = vector.shape_cast %119 : vector<8x8xf32> to vector<8x8x1xf32>
    %121 = vector.broadcast %120 : vector<8x8x1xf32> to vector<8x8x16xf32>
    %122 = arith.divf %118, %121 : vector<8x8x16xf32>
    %cst_26 = arith.constant dense<0.000000e+00> : vector<8x8x12xf32>
    %123 = tpu.matmul %122, %96, %cst_26 {dimension_numbers = #tpu.dot_dimension_numbers<[2], [1], [1], [2], [0, 0, 0, 1, 1, 2], [0], [0]>} : vector<8x8x16xf32>, vector<8x16x12xf32>, vector<8x8x12xf32> -> vector<8x8x12xf32>
    %124 = vector.extract_strided_slice %123 {offsets = [0, 0, 0], sizes = [1, 8, 12], strides = [1, 1, 1]} : vector<8x8x12xf32> to vector<1x8x12xf32>
    %125 = vector.shape_cast %124 : vector<1x8x12xf32> to vector<8x12xf32>
    %126 = vector.extract_strided_slice %123 {offsets = [1, 0, 0], sizes = [1, 8, 12], strides = [1, 1, 1]} : vector<8x8x12xf32> to vector<1x8x12xf32>
    %127 = vector.shape_cast %126 : vector<1x8x12xf32> to vector<8x12xf32>
    %128 = vector.extract_strided_slice %123 {offsets = [2, 0, 0], sizes = [1, 8, 12], strides = [1, 1, 1]} : vector<8x8x12xf32> to vector<1x8x12xf32>
    %129 = vector.shape_cast %128 : vector<1x8x12xf32> to vector<8x12xf32>
    %130 = vector.extract_strided_slice %123 {offsets = [3, 0, 0], sizes = [1, 8, 12], strides = [1, 1, 1]} : vector<8x8x12xf32> to vector<1x8x12xf32>
    %131 = vector.shape_cast %130 : vector<1x8x12xf32> to vector<8x12xf32>
    %132 = tpu.concatenate %125, %127, %129, %131 in 1 : vector<8x12xf32>, vector<8x12xf32>, vector<8x12xf32>, vector<8x12xf32> -> vector<8x48xf32>
    %133 = vector.extract_strided_slice %123 {offsets = [4, 0, 0], sizes = [1, 8, 12], strides = [1, 1, 1]} : vector<8x8x12xf32> to vector<1x8x12xf32>
    %134 = vector.shape_cast %133 : vector<1x8x12xf32> to vector<8x12xf32>
    %135 = vector.extract_strided_slice %123 {offsets = [5, 0, 0], sizes = [1, 8, 12], strides = [1, 1, 1]} : vector<8x8x12xf32> to vector<1x8x12xf32>
    %136 = vector.shape_cast %135 : vector<1x8x12xf32> to vector<8x12xf32>
    %137 = vector.extract_strided_slice %123 {offsets = [6, 0, 0], sizes = [1, 8, 12], strides = [1, 1, 1]} : vector<8x8x12xf32> to vector<1x8x12xf32>
    %138 = vector.shape_cast %137 : vector<1x8x12xf32> to vector<8x12xf32>
    %139 = vector.extract_strided_slice %123 {offsets = [7, 0, 0], sizes = [1, 8, 12], strides = [1, 1, 1]} : vector<8x8x12xf32> to vector<1x8x12xf32>
    %140 = vector.shape_cast %139 : vector<1x8x12xf32> to vector<8x12xf32>
    %141 = tpu.concatenate %134, %136, %138, %140 in 1 : vector<8x12xf32>, vector<8x12xf32>, vector<8x12xf32>, vector<8x12xf32> -> vector<8x48xf32>
    %142 = tpu.concatenate %132, %141 in 0 : vector<8x48xf32>, vector<8x48xf32> -> vector<16x48xf32>
    %c0_27 = arith.constant 0 : index
    %c0_28 = arith.constant 0 : index
    %143 = vector.load %arg7[%c0_27, %c0_28] : memref<48x48xf32, #tpu.memory_space<vmem>>, vector<48x48xf32>
    %cst_29 = arith.constant dense<0.000000e+00> : vector<16x48xf32>
    %144 = tpu.matmul %142, %143, %cst_29 {dimension_numbers = #tpu.dot_dimension_numbers<[1], [0], [0], [1], [0, 0, 1, 1], [], []>} : vector<16x48xf32>, vector<48x48xf32>, vector<16x48xf32> -> vector<16x48xf32>
    %c0_30 = arith.constant 0 : index
    %c0_31 = arith.constant 0 : index
    %145 = vector.load %arg8[%c0_30, %c0_31] : memref<1x48xf32, #tpu.memory_space<vmem>>, vector<1x48xf32>
    %146 = vector.broadcast %145 : vector<1x48xf32> to vector<16x48xf32>
    %147 = arith.addf %144, %146 : vector<16x48xf32>
    %cst_32 = arith.constant dense<0.000000e+00> : vector<16xf32>
    %148 = vector.multi_reduction <add>, %147, %cst_32 [1] : vector<16x48xf32> to vector<16xf32>
    %149 = vector.shape_cast %148 : vector<16xf32> to vector<16x1xf32>
    %cst_33 = arith.constant 4.800000e+01 : f32
    %150 = vector.broadcast %cst_33 : f32 to vector<16x1xf32>
    %151 = arith.divf %149, %150 : vector<16x1xf32>
    %152 = vector.broadcast %151 : vector<16x1xf32> to vector<16x48xf32>
    %153 = arith.subf %147, %152 : vector<16x48xf32>
    %154 = arith.mulf %153, %153 : vector<16x48xf32>
    %cst_34 = arith.constant dense<0.000000e+00> : vector<16xf32>
    %155 = vector.multi_reduction <add>, %154, %cst_34 [1] : vector<16x48xf32> to vector<16xf32>
    %156 = vector.shape_cast %155 : vector<16xf32> to vector<16x1xf32>
    %cst_35 = arith.constant 4.800000e+01 : f32
    %157 = vector.broadcast %cst_35 : f32 to vector<16x1xf32>
    %158 = arith.divf %156, %157 : vector<16x1xf32>
    %159 = vector.broadcast %151 : vector<16x1xf32> to vector<16x48xf32>
    %160 = arith.subf %147, %159 : vector<16x48xf32>
    %cst_36 = arith.constant 9.99999974E-6 : f32
    %161 = vector.broadcast %cst_36 : f32 to vector<16x1xf32>
    %162 = arith.addf %158, %161 : vector<16x1xf32>
    %163 = math.rsqrt %162 : vector<16x1xf32>
    %164 = vector.broadcast %163 : vector<16x1xf32> to vector<16x48xf32>
    %165 = arith.mulf %160, %164 : vector<16x48xf32>
    %c0_37 = arith.constant 0 : index
    %c0_38 = arith.constant 0 : index
    %166 = vector.load %arg9[%c0_37, %c0_38] : memref<1x48xf32, #tpu.memory_space<vmem>>, vector<1x48xf32>
    %167 = vector.broadcast %166 : vector<1x48xf32> to vector<16x48xf32>
    %168 = arith.mulf %165, %167 : vector<16x48xf32>
    %c0_39 = arith.constant 0 : index
    %c0_40 = arith.constant 0 : index
    %169 = vector.load %arg10[%c0_39, %c0_40] : memref<1x48xf32, #tpu.memory_space<vmem>>, vector<1x48xf32>
    %170 = vector.broadcast %169 : vector<1x48xf32> to vector<16x48xf32>
    %171 = arith.addf %168, %170 : vector<16x48xf32>
    %172 = arith.addf %6, %171 : vector<16x48xf32>
    %cst_41 = arith.constant dense<0.000000e+00> : vector<16xf32>
    %173 = vector.multi_reduction <add>, %172, %cst_41 [1] : vector<16x48xf32> to vector<16xf32>
    %174 = vector.shape_cast %173 : vector<16xf32> to vector<16x1xf32>
    %cst_42 = arith.constant 4.800000e+01 : f32
    %175 = vector.broadcast %cst_42 : f32 to vector<16x1xf32>
    %176 = arith.divf %174, %175 : vector<16x1xf32>
    %177 = vector.broadcast %176 : vector<16x1xf32> to vector<16x48xf32>
    %178 = arith.subf %172, %177 : vector<16x48xf32>
    %179 = arith.mulf %178, %178 : vector<16x48xf32>
    %cst_43 = arith.constant dense<0.000000e+00> : vector<16xf32>
    %180 = vector.multi_reduction <add>, %179, %cst_43 [1] : vector<16x48xf32> to vector<16xf32>
    %181 = vector.shape_cast %180 : vector<16xf32> to vector<16x1xf32>
    %cst_44 = arith.constant 4.800000e+01 : f32
    %182 = vector.broadcast %cst_44 : f32 to vector<16x1xf32>
    %183 = arith.divf %181, %182 : vector<16x1xf32>
    %184 = vector.broadcast %176 : vector<16x1xf32> to vector<16x48xf32>
    %185 = arith.subf %172, %184 : vector<16x48xf32>
    %cst_45 = arith.constant 9.99999974E-6 : f32
    %186 = vector.broadcast %cst_45 : f32 to vector<16x1xf32>
    %187 = arith.addf %183, %186 : vector<16x1xf32>
    %188 = math.rsqrt %187 : vector<16x1xf32>
    %189 = vector.broadcast %188 : vector<16x1xf32> to vector<16x48xf32>
    %190 = arith.mulf %185, %189 : vector<16x48xf32>
    %c0_46 = arith.constant 0 : index
    %c0_47 = arith.constant 0 : index
    %191 = vector.load %arg11[%c0_46, %c0_47] : memref<48x128xf32, #tpu.memory_space<vmem>>, vector<48x128xf32>
    %cst_48 = arith.constant dense<0.000000e+00> : vector<16x128xf32>
    %192 = tpu.matmul %190, %191, %cst_48 {dimension_numbers = #tpu.dot_dimension_numbers<[1], [0], [0], [1], [0, 0, 1, 1], [], []>} : vector<16x48xf32>, vector<48x128xf32>, vector<16x128xf32> -> vector<16x128xf32>
    %193 = vector.extract_strided_slice %192 {offsets = [0, 0], sizes = [16, 64], strides = [1, 1]} : vector<16x128xf32> to vector<16x64xf32>
    %194 = vector.extract_strided_slice %192 {offsets = [0, 64], sizes = [16, 64], strides = [1, 1]} : vector<16x128xf32> to vector<16x64xf32>
    %cst_49 = arith.constant 5.000000e-01 : f32
    %195 = vector.broadcast %cst_49 : f32 to vector<16x64xf32>
    %196 = arith.mulf %195, %194 : vector<16x64xf32>
    %cst_50 = arith.constant 0.707106769 : f32
    %197 = vector.broadcast %cst_50 : f32 to vector<16x64xf32>
    %198 = arith.mulf %194, %197 : vector<16x64xf32>
    %cst_51 = arith.constant 0.000000e+00 : f32
    %199 = vector.broadcast %cst_51 : f32 to vector<16x64xf32>
    %200 = arith.cmpf oge, %198, %199 : vector<16x64xf32>
    %cst_52 = arith.constant 1.000000e+00 : f32
    %cst_53 = arith.constant -1.000000e+00 : f32
    %201 = vector.broadcast %cst_52 : f32 to vector<16x64xf32>
    %202 = vector.broadcast %cst_53 : f32 to vector<16x64xf32>
    %203 = arith.select %200, %201, %202 : vector<16x64xi1>, vector<16x64xf32>
    %204 = math.absf %198 : vector<16x64xf32>
    %cst_54 = arith.constant 0.327591091 : f32
    %205 = vector.broadcast %cst_54 : f32 to vector<16x64xf32>
    %206 = arith.mulf %205, %204 : vector<16x64xf32>
    %cst_55 = arith.constant 1.000000e+00 : f32
    %207 = vector.broadcast %cst_55 : f32 to vector<16x64xf32>
    %208 = arith.addf %207, %206 : vector<16x64xf32>
    %cst_56 = arith.constant 1.000000e+00 : f32
    %209 = vector.broadcast %cst_56 : f32 to vector<16x64xf32>
    %210 = arith.divf %209, %208 : vector<16x64xf32>
    %cst_57 = arith.constant 1.06140542 : f32
    %211 = vector.broadcast %cst_57 : f32 to vector<16x64xf32>
    %212 = arith.mulf %211, %210 : vector<16x64xf32>
    %cst_58 = arith.constant -1.45315206 : f32
    %213 = vector.broadcast %cst_58 : f32 to vector<16x64xf32>
    %214 = arith.addf %212, %213 : vector<16x64xf32>
    %215 = arith.mulf %214, %210 : vector<16x64xf32>
    %cst_59 = arith.constant 1.42141378 : f32
    %216 = vector.broadcast %cst_59 : f32 to vector<16x64xf32>
    %217 = arith.addf %215, %216 : vector<16x64xf32>
    %218 = arith.mulf %217, %210 : vector<16x64xf32>
    %cst_60 = arith.constant -0.284496725 : f32
    %219 = vector.broadcast %cst_60 : f32 to vector<16x64xf32>
    %220 = arith.addf %218, %219 : vector<16x64xf32>
    %221 = arith.mulf %220, %210 : vector<16x64xf32>
    %cst_61 = arith.constant 0.254829586 : f32
    %222 = vector.broadcast %cst_61 : f32 to vector<16x64xf32>
    %223 = arith.addf %221, %222 : vector<16x64xf32>
    %224 = arith.mulf %223, %210 : vector<16x64xf32>
    %cst_62 = arith.constant 0.000000e+00 : f32
    %225 = vector.broadcast %cst_62 : f32 to vector<16x64xf32>
    %226 = arith.subf %225, %204 : vector<16x64xf32>
    %227 = arith.mulf %226, %204 : vector<16x64xf32>
    %228 = math.exp %227 : vector<16x64xf32>
    %229 = arith.mulf %224, %228 : vector<16x64xf32>
    %cst_63 = arith.constant 1.000000e+00 : f32
    %230 = vector.broadcast %cst_63 : f32 to vector<16x64xf32>
    %231 = arith.subf %230, %229 : vector<16x64xf32>
    %232 = arith.mulf %203, %231 : vector<16x64xf32>
    %cst_64 = arith.constant 1.000000e+00 : f32
    %233 = vector.broadcast %cst_64 : f32 to vector<16x64xf32>
    %234 = arith.addf %233, %232 : vector<16x64xf32>
    %235 = arith.mulf %196, %234 : vector<16x64xf32>
    %236 = arith.mulf %193, %235 : vector<16x64xf32>
    %cst_65 = arith.constant dense<0.000000e+00> : vector<16xf32>
    %237 = vector.multi_reduction <add>, %236, %cst_65 [1] : vector<16x64xf32> to vector<16xf32>
    %238 = vector.shape_cast %237 : vector<16xf32> to vector<16x1xf32>
    %cst_66 = arith.constant 6.400000e+01 : f32
    %239 = vector.broadcast %cst_66 : f32 to vector<16x1xf32>
    %240 = arith.divf %238, %239 : vector<16x1xf32>
    %241 = vector.broadcast %240 : vector<16x1xf32> to vector<16x64xf32>
    %242 = arith.subf %236, %241 : vector<16x64xf32>
    %243 = arith.mulf %242, %242 : vector<16x64xf32>
    %cst_67 = arith.constant dense<0.000000e+00> : vector<16xf32>
    %244 = vector.multi_reduction <add>, %243, %cst_67 [1] : vector<16x64xf32> to vector<16xf32>
    %245 = vector.shape_cast %244 : vector<16xf32> to vector<16x1xf32>
    %cst_68 = arith.constant 6.400000e+01 : f32
    %246 = vector.broadcast %cst_68 : f32 to vector<16x1xf32>
    %247 = arith.divf %245, %246 : vector<16x1xf32>
    %248 = vector.broadcast %240 : vector<16x1xf32> to vector<16x64xf32>
    %249 = arith.subf %236, %248 : vector<16x64xf32>
    %cst_69 = arith.constant 9.99999974E-6 : f32
    %250 = vector.broadcast %cst_69 : f32 to vector<16x1xf32>
    %251 = arith.addf %247, %250 : vector<16x1xf32>
    %252 = math.rsqrt %251 : vector<16x1xf32>
    %253 = vector.broadcast %252 : vector<16x1xf32> to vector<16x64xf32>
    %254 = arith.mulf %249, %253 : vector<16x64xf32>
    %c0_70 = arith.constant 0 : index
    %c0_71 = arith.constant 0 : index
    %255 = vector.load %arg12[%c0_70, %c0_71] : memref<64x48xf32, #tpu.memory_space<vmem>>, vector<64x48xf32>
    %cst_72 = arith.constant dense<0.000000e+00> : vector<16x48xf32>
    %256 = tpu.matmul %254, %255, %cst_72 {dimension_numbers = #tpu.dot_dimension_numbers<[1], [0], [0], [1], [0, 0, 1, 1], [], []>} : vector<16x64xf32>, vector<64x48xf32>, vector<16x48xf32> -> vector<16x48xf32>
    %257 = arith.addf %172, %256 : vector<16x48xf32>
    %258 = vector.extract_strided_slice %257 {offsets = [0, 0], sizes = [8, 48], strides = [1, 1]} : vector<16x48xf32> to vector<8x48xf32>
    %259 = vector.extract_strided_slice %257 {offsets = [8, 0], sizes = [8, 48], strides = [1, 1]} : vector<16x48xf32> to vector<8x48xf32>
    %260 = vector.shape_cast %258 : vector<8x48xf32> to vector<8x1x48xf32>
    %261 = vector.shape_cast %259 : vector<8x48xf32> to vector<8x1x48xf32>
    %262 = tpu.concatenate %260, %261 in 1 : vector<8x1x48xf32>, vector<8x1x48xf32> -> vector<8x2x48xf32>
    %c0_73 = arith.constant 0 : index
    %c0_74 = arith.constant 0 : index
    %c0_75 = arith.constant 0 : index
    %263 = vector.load %arg13[%c0_73, %c0_74, %c0_75] : memref<8x2x48xf32, #tpu.memory_space<vmem>>, vector<8x2x48xf32>
    tpu.vector_store %arg13[%c0_73, %c0_74, %c0_75], %262 {strides = array<i32>} : memref<8x2x48xf32, #tpu.memory_space<vmem>>, vector<8x2x48xf32>,
    return
  }
  func.func @transform_0(%arg0: i32) -> (i32, i32, i32) {
    %c0_i32 = arith.constant 0 : i32
    %c0_i32_0 = arith.constant 0 : i32
    %c0_i32_1 = arith.constant 0 : i32
    %c0_i32_2 = arith.constant 0 : i32
    return %c0_i32, %c0_i32_0, %c0_i32_1 : i32, i32, i32
  }
  func.func @transform_1(%arg0: i32) -> (i32, i32, i32) {
    %c0_i32 = arith.constant 0 : i32
    %c0_i32_0 = arith.constant 0 : i32
    %c0_i32_1 = arith.constant 0 : i32
    %c0_i32_2 = arith.constant 0 : i32
    return %c0_i32, %c0_i32_0, %c0_i32_1 : i32, i32, i32
  }
  func.func @transform_2(%arg0: i32) -> (i32, i32) {
    %c0_i32 = arith.constant 0 : i32
    %c0_i32_0 = arith.constant 0 : i32
    %c0_i32_1 = arith.constant 0 : i32
    return %c0_i32, %c0_i32_0 : i32, i32
  }
  func.func @transform_3(%arg0: i32) -> (i32, i32) {
    %c0_i32 = arith.constant 0 : i32
    %c0_i32_0 = arith.constant 0 : i32
    %c0_i32_1 = arith.constant 0 : i32
    return %c0_i32, %c0_i32_0 : i32, i32
  }
  func.func @transform_4(%arg0: i32) -> (i32, i32) {
    %c0_i32 = arith.constant 0 : i32
    %c0_i32_0 = arith.constant 0 : i32
    %c0_i32_1 = arith.constant 0 : i32
    return %c0_i32, %c0_i32_0 : i32, i32
  }
  func.func @transform_5(%arg0: i32) -> (i32, i32) {
    %c0_i32 = arith.constant 0 : i32
    %c0_i32_0 = arith.constant 0 : i32
    %c0_i32_1 = arith.constant 0 : i32
    return %c0_i32, %c0_i32_0 : i32, i32
  }
  func.func @transform_6(%arg0: i32) -> (i32, i32) {
    %c0_i32 = arith.constant 0 : i32
    %c0_i32_0 = arith.constant 0 : i32
    %c0_i32_1 = arith.constant 0 : i32
    return %c0_i32, %c0_i32_0 : i32, i32
  }
  func.func @transform_7(%arg0: i32) -> (i32, i32) {
    %c0_i32 = arith.constant 0 : i32
    %c0_i32_0 = arith.constant 0 : i32
    %c0_i32_1 = arith.constant 0 : i32
    return %c0_i32, %c0_i32_0 : i32, i32
  }
  func.func @transform_8(%arg0: i32) -> (i32, i32) {
    %c0_i32 = arith.constant 0 : i32
    %c0_i32_0 = arith.constant 0 : i32
    %c0_i32_1 = arith.constant 0 : i32
    return %c0_i32, %c0_i32_0 : i32, i32
  }
  func.func @transform_9(%arg0: i32) -> (i32, i32) {
    %c0_i32 = arith.constant 0 : i32
    %c0_i32_0 = arith.constant 0 : i32
    %c0_i32_1 = arith.constant 0 : i32
    return %c0_i32, %c0_i32_0 : i32, i32
  }
  func.func @transform_10(%arg0: i32) -> (i32, i32) {
    %c0_i32 = arith.constant 0 : i32
    %c0_i32_0 = arith.constant 0 : i32
    %c0_i32_1 = arith.constant 0 : i32
    return %c0_i32, %c0_i32_0 : i32, i32
  }
  func.func @transform_11(%arg0: i32) -> (i32, i32) {
    %c0_i32 = arith.constant 0 : i32
    %c0_i32_0 = arith.constant 0 : i32
    %c0_i32_1 = arith.constant 0 : i32
    return %c0_i32, %c0_i32_0 : i32, i32
  }
  func.func @transform_12(%arg0: i32) -> (i32, i32, i32) {
    %c0_i32 = arith.constant 0 : i32
    %c0_i32_0 = arith.constant 0 : i32
    %c0_i32_1 = arith.constant 0 : i32
    %c0_i32_2 = arith.constant 0 : i32
    return %c0_i32, %c0_i32_0, %c0_i32_1 : i32, i32, i32
  }
}

</mosaic_0001>

<bundles_post_ra>
// kernel: tpu_custom_call.1
= control target key start
LH: loop header
LB: loop body
LE: loop exit
PB: predicated region body
PF: predicated region fallthrough
CT: control target
= control target key end

     0   :  { %17 = vsyncpa [#allocation3], 0  ;;  %s3845_s0 = inlined_call_operand.hbm [shape: f32[8,2,48], index: 0, kind: input, shape index: {}]   ;;  %s3846_s1 = inlined_call_operand.hbm [shape: f32[8,2,48], index: 1, kind: input, shape index: {}]   ;;  %s3847_s2 = inlined_call_operand.vmem [shape: f32[48,48], index: 2, kind: input, shape index: {}]   ;;  %s3848_s3 = inlined_call_operand.vmem [shape: f32[1,48], index: 3, kind: input, shape index: {}]   ;;  %s3849_s4 = inlined_call_operand.vmem [shape: f32[48,96], index: 4, kind: input, shape index: {}]   ;;  %s3850_s5 = inlined_call_operand.vmem [shape: f32[1,96], index: 5, kind: input, shape index: {}]   ;;  %s3851_s6 = inlined_call_operand.hbm [shape: f32[48,48], index: 6, kind: input, shape index: {}]   ;;  %s3852_s7 = inlined_call_operand.hbm [shape: f32[1,48], index: 7, kind: input, shape index: {}]   ;;  %s3853_s8 = inlined_call_operand.hbm [shape: f32[1,48], index: 8, kind: input, shape index: {}]   ;;  %s3854_s9 = inlined_call_operand.hbm [shape: f32[1,48], index: 9, kind: input, shape index: {}]   ;;  %s3855_s10 = inlined_call_operand.vmem [shape: f32[48,128], index: 10, kind: input, shape index: {}]   ;;  %s3856_s11 = inlined_call_operand.vmem [shape: f32[64,48], index: 11, kind: input, shape index: {}]   ;;  %s3857_s12 = inlined_call_operand.hbm [shape: f32[8,2,48], index: 12, kind: output, shape index: {}]  }
   0x1   :  { %18 = vsyncpa [#allocation6], 0 }
   0x2   :  { %19 = vsyncpa [#allocation9], 0 }
   0x3   :  { %20 = vsyncpa [#allocation12], 0 }
   0x4   :  { %21 = vsyncpa [#allocation4], 0  ;;  %s3260_s21 = smov [#allocation5]   ;;  %s3261_s23 = smov [#allocation8]  }
   0x5   :  { %s39_s22 = sshll.u32 %s3260_s21, 4  ;;  %s72_s24 = sshll.u32 %s3261_s23, 4  ;;  %s40_s22 = int_to_ptr.vmem [resolvable:$true] %s39_s22  ;;  %s3349_s24 = int_to_ptr.vmem [resolvable:$true] %s72_s24 }
   0x6   :  { %s3096_s27 = scalar_lea.hbm %s3846_s1, 256 }
   0x7   :  { %p3097_p0 = scmp.ne.s32.totalorder %s3846_s1, %s3096_s27  ;;  %p3100_p1 = scmp.lt.u32.totalorder %s3096_s27, %s3846_s1 }
   0x9   :  { %p3102_p2 = pnand %p3100_p1, %p3097_p0 }
   0xb   :  { %3105 = shalt.err (!%p3102_p2)
}
   0xc   :  { %s3106_s14 = scalar_lea.vmem %s40_s22, 256  ;;  %p3111_p4 = scmp.lt.s32.totalorder %s40_s22, %s40_s22 }
   0xd   :  { %p3107_p3 = scmp.ne.s32.totalorder %s40_s22, %s3106_s14  ;;  %p3112_p5 = scmp.lt.s32.totalorder %s3106_s14, %s3106_s14 }
   0xf   :  { %p3113_p6 = por %p3112_p5, %p3111_p4 }
  0x11   :  { %p3114_p7 = pnand %p3113_p6, %p3107_p3 }
  0x13   :  { %3117 = shalt.err (!%p3114_p7)
}
  0x14   :  { %s3262_s15 = smov 32   ;;  %s3263_s16 = smov 2  }
  0x15   :  { %45 = dma.hbm_to_vmem [thread:$0]  %s3846_s1, 256, %s40_s22, [#allocation6], %s3262_s15, %s3262_s15, %s3263_s16  }
  0x16   :  { %s3118_s21 = scalar_lea.hbm %s3852_s7, 16 }
  0x17   :  { %p3119_p8 = scmp.ne.s32.totalorder %s3852_s7, %s3118_s21  ;;  %p3122_p9 = scmp.lt.u32.totalorder %s3118_s21, %s3852_s7 }
  0x19   :  { %p3124_p10 = pnand %p3122_p9, %p3119_p8 }
  0x1b   :  { %3127 = shalt.err (!%p3124_p10)
}
  0x1c   :  { %s3128_s28 = scalar_lea.vmem %s3349_s24, 16  ;;  %s3132_s1 = scalar_lea.vmem %s3349_s24, 32 }
  0x1d   :  { %p3129_p11 = scmp.ne.s32.totalorder %s3349_s24, %s3128_s28  ;;  %p3133_p12 = scmp.lt.s32.totalorder %s3349_s24, %s3349_s24 }
  0x1e   :  { %p3134_p13 = scmp.lt.s32.totalorder %s3132_s1, %s3128_s28 }
  0x20   :  { %p3135_p0 = por %p3134_p13, %p3133_p12 }
  0x22   :  { %p3136_p1 = pnand %p3135_p0, %p3129_p11 }
  0x24   :  { %3139 = shalt.err (!%p3136_p1)
}
  0x25   :  { %75 = dma.hbm_to_vmem [thread:$0]  %s3852_s7, 16, %s3349_s24, [#allocation9]  }
  0x26   :  { %s3264_s30 = smov [#allocation2]   ;;  %s3265_s14 = smov [#allocation7]  }
  0x27   :  { %s27_s13 = sshll.u32 %s3264_s30, 4  ;;  %s59_s17 = sshll.u32 %s3265_s14, 4  ;;  %s28_s13 = int_to_ptr.vmem [resolvable:$true] %s27_s13  ;;  %s3384_s17 = int_to_ptr.vmem [resolvable:$true] %s59_s17 }
  0x28   :  { %s3140_s20 = scalar_lea.hbm %s3845_s0, 256 }
  0x29   :  { %p3141_p2 = scmp.ne.s32.totalorder %s3845_s0, %s3140_s20  ;;  %p3144_p3 = scmp.lt.u32.totalorder %s3140_s20, %s3845_s0 }
  0x2b   :  { %p3146_p4 = pnand %p3144_p3, %p3141_p2 }
  0x2d   :  { %3149 = shalt.err (!%p3146_p4)
}
  0x2e   :  { %s3150_s7 = scalar_lea.vmem %s28_s13, 256  ;;  %p3155_p6 = scmp.lt.s32.totalorder %s28_s13, %s28_s13 }
  0x2f   :  { %p3151_p5 = scmp.ne.s32.totalorder %s28_s13, %s3150_s7  ;;  %p3156_p7 = scmp.lt.s32.totalorder %s3150_s7, %s3150_s7 }
  0x31   :  { %p3157_p8 = por %p3156_p7, %p3155_p6 }
  0x33   :  { %p3158_p9 = pnand %p3157_p8, %p3151_p5 }
  0x35   :  { %3161 = shalt.err (!%p3158_p9)
}
  0x36   :  { %33 = dma.hbm_to_vmem [thread:$0]  %s3845_s0, 256, %s28_s13, [#allocation3], %s3262_s15, %s3262_s15, %s3263_s16  }
  0x37   :  { %s3162_s22 = scalar_lea.hbm %s3851_s6, 768 }
  0x38   :  { %p3163_p10 = scmp.ne.s32.totalorder %s3851_s6, %s3162_s22  ;;  %p3166_p11 = scmp.lt.u32.totalorder %s3162_s22, %s3851_s6 }
  0x3a   :  { %p3168_p12 = pnand %p3166_p11, %p3163_p10 }
  0x3c   :  { %3171 = shalt.err (!%p3168_p12)
}
  0x3d   :  { %s3172_s19 = scalar_lea.vmem %s3384_s17, 768  ;;  %p3177_p0 = scmp.lt.s32.totalorder %s3384_s17, %s3384_s17 }
  0x3e   :  { %p3173_p13 = scmp.ne.s32.totalorder %s3384_s17, %s3172_s19  ;;  %p3178_p1 = scmp.lt.s32.totalorder %s3172_s19, %s3172_s19 }
  0x40   :  { %p3179_p2 = por %p3178_p1, %p3177_p0 }
  0x42   :  { %p3180_p3 = pnand %p3179_p2, %p3173_p13 }
  0x44   :  { %3183 = shalt.err (!%p3180_p3)
}
  0x45   :  { %s3266_s0 = smov 128   ;;  %s3267_s13 = smov 8  }
  0x46   :  { %65 = dma.hbm_to_vmem [thread:$0]  %s3851_s6, 768, %s3384_s17, [#allocation6], %s3266_s0, %s3266_s0, %s3267_s13  }
  0x47   :  { %s3268_s23 = smov [#allocation10]   ;;  %s3269_s26 = smov [#allocation11]  }
  0x48   :  { %s82_s25 = sshll.u32 %s3268_s23, 4  ;;  %s92_s7 = sshll.u32 %s3269_s26, 4  ;;  %s83_s25 = int_to_ptr.vmem [resolvable:$true] %s82_s25  ;;  %s93_s7 = int_to_ptr.vmem [resolvable:$true] %s92_s7 }
  0x49   :  { %s3184_s28 = scalar_lea.hbm %s3853_s8, 16 }
  0x4a   :  { %p3185_p4 = scmp.ne.s32.totalorder %s3853_s8, %s3184_s28  ;;  %p3188_p5 = scmp.lt.u32.totalorder %s3184_s28, %s3853_s8 }
  0x4c   :  { %p3190_p6 = pnand %p3188_p5, %p3185_p4 }
  0x4e   :  { %3193 = shalt.err (!%p3190_p6)
}
  0x4f   :  { %s3194_s6 = scalar_lea.vmem %s83_s25, 16  ;;  %s3198_s17 = scalar_lea.vmem %s83_s25, 32 }
  0x50   :  { %p3195_p7 = scmp.ne.s32.totalorder %s83_s25, %s3194_s6  ;;  %p3199_p8 = scmp.lt.s32.totalorder %s83_s25, %s83_s25 }
  0x51   :  { %p3200_p9 = scmp.lt.s32.totalorder %s3198_s17, %s3194_s6 }
  0x53   :  { %p3201_p10 = por %p3200_p9, %p3199_p8 }
  0x55   :  { %p3202_p11 = pnand %p3201_p10, %p3195_p7 }
  0x57   :  { %3205 = shalt.err (!%p3202_p11)
}
  0x58   :  { %85 = dma.hbm_to_vmem [thread:$0]  %s3853_s8, 16, %s83_s25, [#allocation9]  }
  0x59   :  { %s3206_s13 = scalar_lea.hbm %s3854_s9, 16 }
  0x5a   :  { %p3207_p12 = scmp.ne.s32.totalorder %s3854_s9, %s3206_s13  ;;  %p3210_p13 = scmp.lt.u32.totalorder %s3206_s13, %s3854_s9 }
  0x5c   :  { %p3212_p0 = pnand %p3210_p13, %p3207_p12 }
  0x5e   :  { %3215 = shalt.err (!%p3212_p0)
}
  0x5f   :  { %s3216_s24 = scalar_lea.vmem %s93_s7, 16  ;;  %s3220_s27 = scalar_lea.vmem %s93_s7, 32 }
  0x60   :  { %p3217_p1 = scmp.ne.s32.totalorder %s93_s7, %s3216_s24  ;;  %p3221_p2 = scmp.lt.s32.totalorder %s93_s7, %s93_s7 }
  0x61   :  { %p3222_p3 = scmp.lt.s32.totalorder %s3220_s27, %s3216_s24 }
  0x63   :  { %p3223_p4 = por %p3222_p3, %p3221_p2 }
  0x65   :  { %p3224_p5 = pnand %p3223_p4, %p3217_p1 }
  0x67   :  { %3227 = shalt.err (!%p3224_p5)
}
  0x68   :  { %95 = dma.hbm_to_vmem [thread:$0]  %s3854_s9, 16, %s93_s7, [#allocation12]  }
  0x69   :  { %3250 = dma.done.wait [#allocation3], 256  }
  0x6a   :  { %3251 = vsyncadd [#allocation3], 4294967040 }
  0x6b   :  { %3252 = dma.done.wait [#allocation6], 1024  }
  0x6c   :  { %3253 = vsyncadd [#allocation6], 4294966272 }
  0x6d   :  { %3254 = dma.done.wait [#allocation9], 32  }
  0x6e   :  { %3255 = vsyncadd [#allocation9], 4294967264 }
  0x6f   :  { %3256 = dma.done.wait [#allocation12], 16  }
  0x70   :  { %3257 = vsyncadd [#allocation12], 4294967280  ;;  %vm143_vm0 = vcmask 1041409   ;;  %vm146_vm1 = vcmask 1042434   ;;  %v118_v0 = vld [vmem:[#allocation2] sm:$0x3] }
  0x71   :  { %v119_v1 = vld [vmem:[#allocation2 + $0x2] sm:$0x3]  ;;  %v120_v2 = vld [vmem:[#allocation2 + $0x4] sm:$0x3]  ;;  %v121_v3 = vld [vmem:[#allocation2 + $0x6] sm:$0x3] }
  0x72   :  { %v122_v4 = vld [vmem:[#allocation2 + $0x8] sm:$0x3]  ;;  %v123_v5 = vld [vmem:[#allocation2 + $0xa] sm:$0x3]  ;;  %v124_v6 = vld [vmem:[#allocation2 + $0xc] sm:$0x3] }
  0x73   :  { %v142_v7 = vrot.slane %v119_v1, 7  ;;  %v145_v8 = vrot.slane %v120_v2, 6  ;;  %vm149_vm2 = vcmask 1043459   ;;  %vm152_vm3 = vcmask 1044484   ;;  %v125_v9 = vld [vmem:[#allocation2 + $0xe] sm:$0x3] }
  0x74   :  { %v148_v10 = vrot.slane %v121_v3, 5  ;;  %v151_v11 = vrot.slane %v122_v4, 4  ;;  %vm155_vm4 = vcmask 1045509   ;;  %vm158_vm5 = vcmask 1046534   ;;  %v337_v48 = vld [vmem:[%s3849_s4] sm:$0xff]  ;;  %v338_v49 = vld [vmem:[%s3849_s4 + $0x8] sm:$0xff] }
  0x75   :  { %v144_v12 = vsel %vm143_vm0, %v142_v7, %v118_v0  ;;  %v154_v13 = vrot.slane %v123_v5, 3  ;;  %v164_v14 = vrot.slane %v118_v0, 1  ;;  %v166_v15 = vrot.slane %v120_v2, 7  ;;  %v243_v51 = vld [vmem:[%s3847_s2] sm:$0xff]  ;;  %v244_v52 = vld [vmem:[%s3847_s2 + $0x8] sm:$0xff]  ;;  %v339_v53 = vld [vmem:[%s3849_s4 + $0x10] sm:$0xff] }
  0x76   :  { %v147_v16 = vsel %vm146_vm1, %v145_v8, %v144_v12  ;;  %v157_v17 = vrot.slane %v124_v6, 2  ;;  %v168_v18 = vrot.slane %v121_v3, 6  ;;  %v170_v19 = vrot.slane %v122_v4, 5  ;;  %v340_v55 = vld [vmem:[%s3849_s4 + $0x18] sm:$0xff]  ;;  %v127_v56 = vld [vmem:[#allocation5 + $0x2] sm:$0x3] }
  0x77   :  { %v150_v20 = vsel %vm149_vm2, %v148_v10, %v147_v16  ;;  %v160_v21 = vrot.slane %v125_v9, 1  ;;  %v165_v22 = vsel %vm143_vm0, %v119_v1, %v164_v14  ;;  %v172_v23 = vrot.slane %v123_v5, 4  ;;  %v128_v57 = vld [vmem:[#allocation5 + $0x4] sm:$0x3]  ;;  %v246_v60 = vld [vmem:[%s3847_s2 + $0x18] sm:$0xff]  ;;  %v341_v61 = vld [vmem:[%s3849_s4 + $0x20] sm:$0xff] }
  0x78   :  { %v153_v24 = vsel %vm152_vm3, %v151_v11, %v150_v20  ;;  %vm161_vm6 = vcmask 1047559   ;;  %v167_v25 = vsel %vm146_vm1, %v166_v15, %v165_v22  ;;  %v174_v26 = vrot.slane %v124_v6, 3  ;;  %v245_v59 = vld [vmem:[%s3847_s2 + $0x10] sm:$0xff]  ;;  %v342_v1 = vld [vmem:[%s3849_s4 + $0x28] sm:$0xff]  ;;  %v130_v6 = vld [vmem:[#allocation5 + $0x8] sm:$0x3] }
  0x79   :  { %v156_v27 = vsel %vm155_vm4, %v154_v13, %v153_v24  ;;  %vm179_vm7 = vcmask 392192   ;;  %v169_v28 = vsel %vm149_vm2, %v168_v18, %v167_v25  ;;  %v176_v29 = vrot.slane %v125_v9, 2  ;;  %v126_v2 = vld [vmem:[#allocation5] sm:$0x3]  ;;  %v129_v3 = vld [vmem:[#allocation5 + $0x6] sm:$0x3] }
  0x7a   :  { %v159_v30 = vsel %vm158_vm5, %v157_v17, %v156_v27  ;;  %v171_v31 = vsel %vm152_vm3, %v170_v19, %v169_v28  ;;  %v2838_v50 = vpack.c.bf16 %v338_v49, %v337_v48  ;;  %v2826_v54 = vpack.c.bf16 %v244_v52, %v243_v51  ;;  %v131_v7 = vld [vmem:[#allocation5 + $0xa] sm:$0x3]  ;;  %v132_v8 = vld [vmem:[#allocation5 + $0xc] sm:$0x3]  ;;  %v133_v10 = vld [vmem:[#allocation5 + $0xe] sm:$0x3] }
  0x7b   :  { %v3453_v32 = vsel %vm161_vm6, %v160_v21, %v159_v30  ;;  %v173_v33 = vsel %vm155_vm4, %v172_v23, %v171_v31  ;;  %v2842_v58 = vpack.c.bf16 %v340_v55, %v339_v53  ;;  %v215_v62 = vrot.slane %v127_v56, 7  ;;  %v247_v15 = vld [vmem:[%s3847_s2 + $0x20] sm:$0xff]  ;;  %v248_v19 = vld [vmem:[%s3847_s2 + $0x28] sm:$0xff]  ;;  %s3274_s28 = smov 104   ;;  %s3275_s29 = smov 92  }
  0x7c   :  { %v180_v34 = vsel %vm179_vm7, %v3453_v32, 0.0  ;;  %v175_v35 = vsel %vm158_vm5, %v174_v26, %v173_v33  ;;  %2839 = vmatprep.subr.bf16.mxu1 %v2838_v50  ;;  %v217_v63 = vrot.slane %v128_v57, 6  ;;  %2827 = vmatprep.subr.bf16.mxu0 %v2826_v54  ;;  %v2830_v0 = vpack.c.bf16 %v246_v60, %v245_v59  ;;  %s3277_s30 = smov 12   ;;  %s3278_s6 = smov 24  }
  0x7d   :  { %181 = vadd.xlane.f32.xlu0 %v180_v34  ;;  %v3460_v36 = vsel %vm161_vm6, %v176_v29, %v175_v35  ;;  %2841 = vmatpush3.bf16.msra.mxu1 %v2838_v50  ;;  %v231_v4 = vrot.slane %v128_v57, 7  ;;  %v2846_v5 = vpack.c.bf16 %v342_v1, %v341_v61  ;;  %v216_v9 = vsel %vm143_vm0, %v215_v62, %v126_v2  ;;  %s3279_s17 = smov 36  }
  0x7e   :  { %v183_v37 = vsel %vm179_vm7, %v3460_v36, 0.0  ;;  %2843 = vmatprep.subr.bf16.mxu1 %v2842_v58  ;;  %2829 = vmatpush3.bf16.msra.mxu0 %v2826_v54  ;;  %v218_v11 = vsel %vm146_vm1, %v217_v63, %v216_v9  ;;  %v219_v12 = vrot.slane %v129_v3, 5  ;;  %v221_v13 = vrot.slane %v130_v6, 4 }
  0x7f   :  { %2831 = vmatprep.subr.bf16.mxu0 %v2830_v0  ;;  %v223_v14 = vrot.slane %v131_v7, 3  ;;  %v225_v16 = vrot.slane %v132_v8, 2  ;;  %v229_v17 = vrot.slane %v126_v2, 1  ;;  %v233_v18 = vrot.slane %v129_v3, 6  ;;  %v2490_v2 = vld [vmem:[%s3848_s3] ss:$0 sm:$0xff] }
  0x80   :  { %v220_v20 = vsel %vm149_vm2, %v219_v12, %v218_v11  ;;  %v227_v21 = vrot.slane %v133_v10, 1  ;;  %v235_v22 = vrot.slane %v130_v6, 5  ;;  %v237_v24 = vrot.slane %v131_v7, 4  ;;  %s3276_s3 = smov 80  }
  0x81   :  { %184 = vadd.xlane.f32.xlu0 %v183_v37  ;;  %2845 = vmatpush3.bf16.msra.mxu1 %v2842_v58  ;;  %v222_v23 = vsel %vm152_vm3, %v221_v13, %v220_v20  ;;  %v2834_v25 = vpack.c.bf16 %v248_v19, %v247_v15  ;;  %v230_v26 = vsel %vm143_vm0, %v127_v56, %v229_v17  ;;  %v239_v28 = vrot.slane %v132_v8, 3 }
  0x82   :  { %2847 = vmatprep.subr.bf16.mxu1 %v2846_v5  ;;  %2833 = vmatpush3.bf16.msra.mxu0 %v2830_v0  ;;  %v224_v27 = vsel %vm155_vm4, %v223_v14, %v222_v23  ;;  %v232_v29 = vsel %vm146_vm1, %v231_v4, %v230_v26  ;;  %v241_v31 = vrot.slane %v133_v10, 2  ;;  %v3270_v52 = vmov 0.0|0.0  }
  0x83   :  { %v226_v30 = vsel %vm158_vm5, %v225_v16, %v224_v27  ;;  %2835 = vmatprep.subr.bf16.mxu0 %v2834_v25  ;;  %v234_v33 = vsel %vm149_vm2, %v233_v18, %v232_v29  ;;  %vm3271_vm8 = vmmov 0   ;;  %vm490_vm9 = vcmask 97280  }
  0x84   :  { %v228_v34 = vsel %vm161_vm6, %v227_v21, %v226_v30  ;;  %v236_v35 = vsel %vm152_vm3, %v235_v22, %v234_v33  ;;  %vm3545_vm10 = vmpackc.low %vm490_vm9, %vm490_vm9  ;;  %vm1115_vm14 = vcmask 130048   ;;  %vm1849_vm15 = vcmask 195584  }
  0x85   :  { %2849 = vmatpush3.bf16.msra.mxu1 %v2846_v5  ;;  %2659 = vmatprep.mubr.msk.f32.mxu1 %vm179_vm7, %v228_v34  ;;  %v238_v37 = vsel %vm155_vm4, %v237_v24, %v236_v35  ;;  %vm1851_vm0 = vcmask 293888   ;;  %vm2185_vm3 = vcmask 523264   ;;  %vm2452_vm4 = vcmask 1040384  }
  0x86   :  { %2837 = vmatpush3.bf16.msra.mxu0 %v2834_v25  ;;  %2850 = vmatprep.subr.bf16.mxu1 %v3270_v52 }
  0x87   :  { %2858 = vmatprep.subr.bf16.mxu0 %v3270_v52 }
 0x10a   :  { %v182_v38 = vpop.xlane.xlu0 %181 }
 0x10b   :  { %v187_v39 = vmul.f32 0.020833334, %v182_v38  ;;  %v240_v38 = vsel %vm158_vm5, %v239_v28, %v238_v37  ;;  %vm2461_vm5 = vcmask 386048  }
 0x10d   :  { %v3465_v40 = vsub.f32 %v3453_v32, %v187_v39  ;;  %v242_v39 = vsel %vm161_vm6, %v241_v31, %v240_v38 }
 0x10e   :  { %v185_v41 = vpop.xlane.xlu0 %184 }
 0x10f   :  { %v188_v42 = vmul.f32 0.020833334, %v185_v41  ;;  %v191_v43 = vmul.f32 %v3465_v40, %v3465_v40 }
 0x111   :  { %v3470_v44 = vsub.f32 %v3460_v36, %v188_v42  ;;  %v193_v45 = vsel %vm179_vm7, %v191_v43, 0.0 }
 0x112   :  { %194 = vadd.xlane.f32.xlu1 %v193_v45 }
 0x113   :  { %v192_v46 = vmul.f32 %v3470_v44, %v3470_v44 }
 0x115   :  { %v196_v47 = vsel %vm179_vm7, %v192_v46, 0.0 }
 0x116   :  { %197 = vadd.xlane.f32.xlu1 %v196_v47 }
 0x19f   :  { %v195_v41 = vpop.xlane.xlu1 %194 }
 0x1a0   :  { %v199_v42 = vmul.f32 0.020833334, %v195_v41 }
 0x1a2   :  { %v201_v43 = vadd.f32 1e-05, %v199_v42 }
 0x1a3   :  { %v198_v45 = vpop.xlane.xlu1 %197 }
 0x1a4   :  { %3040 = vrsqrt.f32 %v201_v43  ;;  %v200_v46 = vmul.f32 0.020833334, %v198_v45 }
 0x1a6   :  { %v202_v47 = vadd.f32 1e-05, %v200_v46 }
 0x1a8   :  { %3042 = vrsqrt.f32 %v202_v47 }
 0x1ae   :  { %v3041_v48 = vpop.eup %3040 }
 0x1af   :  { %v205_v49 = vmul.f32 %v3041_v48, %v3465_v40  ;;  %v3272_v40 = vmov 0.0  }
 0x1b1   :  { %2644 = vmatprep.mubr.msk.f32.mxu0 %vm179_vm7, %v205_v49  ;;  %2660 = vmatmul.mubr.msk.f32.vlgmr.msra.gmra.mrb[0].mxu1 %vm179_vm7, %v205_v49 }
 0x1b2   :  { %v3043_v50 = vpop.eup %3042  ;;  %2662 = vmatprep.mubr.msk.f32.mxu1 %vm179_vm7, %v242_v39  ;;  %v481_v39 = vlaneseq }
 0x1b3   :  { %v206_v51 = vmul.f32 %v3043_v50, %v3470_v44  ;;  %v2493_v44 = vld [vmem:[%s3850_s5] ss:$0 sm:$0xff]  ;;  %s3273_s5 = smov 116  }
 0x1b4   :  { %v484_v41 = vand.u32 127, %v481_v39  ;;  %v3634_v42 = vshrl.u32 %v481_v39, 7 }
 0x1b5   :  { %2645 = vmatmul.mubr.msk.f32.vlgmr.msra.gmra.mrb[0].mxu0 %vm179_vm7, %v206_v51  ;;  %2663 = vmatmul.mubr.msk.f32.gmra.mrb[2].mxu1 %vm179_vm7, %v206_v51 }
 0x1b6   :  { %2669 = vmatprep.mubr.msk.f32.mxu1 %vm3271_vm8, %v3272_v40  ;;  %2683 = vmatprep.mubr.msk.f32.mxu0 %vm3271_vm8, %v3272_v40  ;;  %v2498_v43 = vadd.s32 4294967288, %v484_v41  ;;  %vm485_vm11 = vcmp.ge.s32.totalorder %v484_v41, 8 }
 0x1b8   :  { %vm487_vm12 = vcmp.gt.s32.totalorder %v2498_v43, %v3634_v42 }
 0x1b9   :  { %vm488_vm13 = vmand %vm485_vm11, %vm487_vm12 }
 0x1ba   :  { %v489_v46 = vsel %vm488_vm13, -1e+09, %v3272_v40 }
 0x284   :  { %v2661_v53 = vpop.f32.mrb[0].mxu1 }
 0x285   :  { %v426_v54 = vadd.f32 %v2661_v53, %v2493_v44  ;;  %v420_v55 = vpop.f32.mrb[1].mxu1 }
 0x286   :  { %v421_v56 = vadd.f32 %v2493_v44, %v420_v55 }
 0x288   :  { %v2646_v58 = vpop.f32.mrb[0].mxu0  ;;  %v2664_v59 = vpop.f32.mrb[2].mxu1  ;;  %v3549_v60 = vpack.i.bf16 %v426_v54, %v421_v56  ;;  %v2851_v61 = vpack.c.bf16 %v426_v54, %v421_v56 }
 0x289   :  { %v436_v62 = vadd.f32 %v2664_v59, %v2493_v44  ;;  %v328_v63 = vpop.f32.mrb[1].mxu0  ;;  %v430_v0 = vpop.f32.mrb[3].mxu1  ;;  %v334_v6 = vadd.f32 %v2646_v58, %v2490_v2 }
 0x28a   :  { %v431_v1 = vadd.f32 %v2493_v44, %v430_v0  ;;  %2971 = vrot.lane.b32.xlu0 %v3549_v60, %s3273_s5  ;;  %2853 = vmatpush3.bf16.xpose.msk.msra.mxu1 %vm3545_vm10, %v2851_v61  ;;  %v329_v5 = vadd.f32 %v2490_v2, %v328_v63 }
 0x28b   :  { %2976 = vrot.lane.b32.xlu1 %v3549_v60, %s3274_s28  ;;  %2854 = vmatprep.subr.bf16.mxu1 %v3270_v52 }
 0x28c   :  { %v3559_v3 = vpack.i.bf16 %v436_v62, %v431_v1  ;;  %v2867_v4 = vpack.c.bf16 %v436_v62, %v431_v1 }
 0x28e   :  { %2986 = vrot.lane.b32.xlu0 %v3559_v3, %s3273_s5 }
 0x28f   :  { %2981 = vrot.lane.b32.xlu1 %v3549_v60, %s3275_s29 }
 0x291   :  { %2670 = vmatmul.mubr.msk.f32.vlgmr.msra.gmra.mrb[4].mxu1 %vm490_vm9, %v329_v5 }
 0x292   :  { %444 = vrot.lane.b32.xlu0 %v329_v5, %s3275_s29  ;;  %2676 = vmatprep.mubr.msk.f32.mxu1 %vm3271_vm8, %v3272_v40 }
 0x293   :  { %440 = vrot.lane.b32.xlu1 %v329_v5, %s3273_s5 }
 0x296   :  { %2996 = vrot.lane.b32.xlu0 %v3559_v3, %s3275_s29 }
 0x297   :  { %442 = vrot.lane.b32.xlu1 %v329_v5, %s3274_s28 }
 0x29a   :  { %449 = vrot.lane.b32.xlu0 %v334_v6, %s3274_s28 }
 0x29b   :  { %2991 = vrot.lane.b32.xlu1 %v3559_v3, %s3274_s28 }
 0x29f   :  { %447 = vrot.lane.b32.xlu1 %v334_v6, %s3273_s5 }
 0x2a3   :  { %451 = vrot.lane.b32.xlu1 %v334_v6, %s3275_s29 }
 0x2fc   :  { %v3568_v7 = vpop.permute.xlu0 %2971 }
 0x2fd   :  { %v3570_v8 = vpop.permute.xlu1 %2976  ;;  %v2974_v9 = vunpack.i.h.bf16 %v3568_v7  ;;  %v2973_v10 = vunpack.i.l.bf16 %v3568_v7 }
 0x2fe   :  { %v2979_v11 = vunpack.i.h.bf16 %v3570_v8  ;;  %v2978_v12 = vunpack.i.l.bf16 %v3570_v8 }
 0x2ff   :  { %v2855_v13 = vpack.c.bf16 %v2974_v9, %v2973_v10 }
 0x300   :  { %v2859_v14 = vpack.c.bf16 %v2979_v11, %v2978_v12  ;;  %v3576_v15 = vpop.permute.xlu0 %2986 }
 0x301   :  { %v3578_v16 = vpop.permute.xlu1 %2981  ;;  %v2989_v17 = vunpack.i.h.bf16 %v3576_v15  ;;  %v2988_v18 = vunpack.i.l.bf16 %v3576_v15  ;;  %2857 = vmatpush3.bf16.xpose.msk.msra.mxu1 %vm3545_vm10, %v2855_v13 }
 0x302   :  { %v2984_v19 = vunpack.i.h.bf16 %v3578_v16  ;;  %v2983_v20 = vunpack.i.l.bf16 %v3578_v16  ;;  %2861 = vmatpush3.bf16.xpose.msk.msra.mxu0 %vm3545_vm10, %v2859_v14  ;;  %2862 = vmatprep.subr.bf16.mxu1 %v3270_v52 }
 0x303   :  { %2866 = vmatprep.subr.bf16.mxu0 %v3270_v52  ;;  %v2871_v31 = vpack.c.bf16 %v2989_v17, %v2988_v18 }
 0x304   :  { %v445_v21 = vpop.permute.xlu0 %444  ;;  %v2863_v23 = vpack.c.bf16 %v2984_v19, %v2983_v20 }
 0x305   :  { %v441_v22 = vpop.permute.xlu1 %440 }
 0x308   :  { %v3590_v24 = vpop.permute.xlu0 %2996  ;;  %2677 = vmatmul.mubr.msk.f32.vlgmr.msra.gmra.mrb[6].mxu1 %vm490_vm9, %v441_v22 }
 0x309   :  { %v443_v25 = vpop.permute.xlu1 %442  ;;  %v2999_v26 = vunpack.i.h.bf16 %v3590_v24  ;;  %v2998_v27 = vunpack.i.l.bf16 %v3590_v24  ;;  %2865 = vmatpush3.bf16.xpose.msk.msra.mxu1 %vm3545_vm10, %v2863_v23  ;;  %2690 = vmatprep.mubr.msk.f32.mxu1 %vm3271_vm8, %v3272_v40 }
 0x30a   :  { %2684 = vmatmul.mubr.msk.f32.vlgmr.msra.gmra.mrb[2].mxu0 %vm490_vm9, %v443_v25  ;;  %2870 = vmatprep.subr.bf16.mxu1 %v3270_v52 }
 0x30b   :  { %2869 = vmatpush3.bf16.xpose.msk.msra.mxu0 %vm3545_vm10, %v2867_v4  ;;  %2697 = vmatprep.mubr.msk.f32.mxu0 %vm3271_vm8, %v3272_v40  ;;  %v2879_v34 = vpack.c.bf16 %v2999_v26, %v2998_v27 }
 0x30c   :  { %2874 = vmatprep.subr.bf16.mxu0 %v3270_v52  ;;  %v450_v37 = vpop.permute.xlu0 %449 }
 0x30d   :  { %v3606_v28 = vpop.permute.xlu1 %2991 }
 0x30e   :  { %v2994_v29 = vunpack.i.h.bf16 %v3606_v28  ;;  %v2993_v30 = vunpack.i.l.bf16 %v3606_v28 }
 0x310   :  { %v2875_v33 = vpack.c.bf16 %v2994_v29, %v2993_v30  ;;  %2691 = vmatmul.mubr.msk.f32.vlgmr.msra.gmra.mrb[8].mxu1 %vm490_vm9, %v445_v21 }
 0x311   :  { %2873 = vmatpush3.bf16.xpose.msk.msra.mxu1 %vm3545_vm10, %v2871_v31  ;;  %2704 = vmatprep.mubr.msk.f32.mxu1 %vm3271_vm8, %v3272_v40  ;;  %v448_v35 = vpop.permute.xlu1 %447 }
 0x312   :  { %2698 = vmatmul.mubr.msk.f32.vlgmr.msra.gmra.mrb[4].mxu0 %vm490_vm9, %v334_v6  ;;  %2878 = vmatprep.subr.bf16.mxu1 %v3270_v52 }
 0x313   :  { %2877 = vmatpush3.bf16.xpose.msk.msra.mxu0 %vm3545_vm10, %v2875_v33  ;;  %2711 = vmatprep.mubr.msk.f32.mxu0 %vm3271_vm8, %v3272_v40 }
 0x314   :  { %2882 = vmatprep.subr.bf16.mxu0 %v3270_v52 }
 0x315   :  { %v452_v38 = vpop.permute.xlu1 %451 }
 0x318   :  { %2705 = vmatmul.mubr.msk.f32.vlgmr.msra.gmra.mrb[10].mxu1 %vm490_vm9, %v448_v35 }
 0x319   :  { %2881 = vmatpush3.bf16.xpose.msk.msra.mxu1 %vm3545_vm10, %v2879_v34  ;;  %2718 = vmatprep.mubr.msk.f32.mxu1 %vm3271_vm8, %v3272_v40 }
 0x31a   :  { %2712 = vmatmul.mubr.msk.f32.vlgmr.msra.gmra.mrb[6].mxu0 %vm490_vm9, %v450_v37  ;;  %2885 = vmatprep.subr.bf16.mxu1 %v3270_v52 }
 0x31b   :  { %2725 = vmatprep.mubr.msk.f32.mxu0 %vm3271_vm8, %v3272_v40 }
 0x320   :  { %2719 = vmatmul.mubr.msk.f32.vlgmr.msra.gmra.mrb[12].mxu1 %vm490_vm9, %v452_v38 }
 0x321   :  { %2732 = vmatprep.mubr.msk.f32.mxu1 %vm3271_vm8, %v3272_v40 }
 0x364   :  { %v563_v45 = vpop.f32.mrb[4].mxu1 }
 0x365   :  { %v1099_v47 = vmul.f32 0.28867513, %v563_v45  ;;  %v2671_v48 = vpop.f32.mrb[5].mxu1 }
 0x367   :  { %v1107_v49 = vadd.f32 %v1099_v47, %v489_v46 }
 0x369   :  { %v1116_v50 = vsel %vm1115_vm14, %v1107_v49, -inf }
 0x36a   :  { %1117 = vmax.xlane.f32.xlu0 %v1116_v50 }
 0x3db   :  { %v639_v51 = vpop.f32.mrb[6].mxu1 }
 0x3dc   :  { %v1100_v44 = vmul.f32 0.28867513, %v639_v51  ;;  %v2678_v53 = vpop.f32.mrb[7].mxu1 }
 0x3dd   :  { %v715_v54 = vpop.f32.mrb[2].mxu0 }
 0x3de   :  { %v1101_v55 = vmul.f32 0.28867513, %v715_v54  ;;  %v2685_v56 = vpop.f32.mrb[3].mxu0  ;;  %v1108_v57 = vadd.f32 %v1100_v44, %v489_v46 }
 0x3e0   :  { %v1119_v58 = vsel %vm1115_vm14, %v1108_v57, -inf  ;;  %v1109_v59 = vadd.f32 %v1101_v55, %v489_v46 }
 0x3e1   :  { %1120 = vmax.xlane.f32.xlu1 %v1119_v58 }
 0x3e2   :  { %v1122_v61 = vsel %vm1115_vm14, %v1109_v59, -inf }
 0x3e3   :  { %1123 = vmax.xlane.f32.xlu0 %v1122_v61  ;;  %v791_v62 = vpop.f32.mrb[8].mxu1 }
 0x3e4   :  { %v1102_v63 = vmul.f32 0.28867513, %v791_v62  ;;  %v2692_v0 = vpop.f32.mrb[9].mxu1 }
 0x3e5   :  { %v867_v1 = vpop.f32.mrb[4].mxu0 }
 0x3e6   :  { %v1103_v2 = vmul.f32 0.28867513, %v867_v1  ;;  %v2699_v4 = vpop.f32.mrb[5].mxu0  ;;  %v1110_v5 = vadd.f32 %v1102_v63, %v489_v46 }
 0x3e8   :  { %v1125_v6 = vsel %vm1115_vm14, %v1110_v5, -inf  ;;  %v1111_v9 = vadd.f32 %v1103_v2, %v489_v46 }
 0x3e9   :  { %1126 = vmax.xlane.f32.xlu0 %v1125_v6 }
 0x3ea   :  { %v1128_v13 = vsel %vm1115_vm14, %v1111_v9, -inf }
 0x3eb   :  { %v943_v10 = vpop.f32.mrb[10].mxu1 }
 0x3ec   :  { %v1104_v11 = vmul.f32 0.28867513, %v943_v10  ;;  %v2706_v12 = vpop.f32.mrb[11].mxu1 }
 0x3ed   :  { %v1019_v14 = vpop.f32.mrb[6].mxu0  ;;  %1129 = vmax.xlane.f32.xlu0 %v1128_v13 }
 0x3ee   :  { %v1105_v17 = vmul.f32 0.28867513, %v1019_v14  ;;  %v2713_v18 = vpop.f32.mrb[7].mxu0  ;;  %v1112_v19 = vadd.f32 %v1104_v11, %v489_v46 }
 0x3f0   :  { %v1113_v20 = vadd.f32 %v1105_v17, %v489_v46  ;;  %v1131_v21 = vsel %vm1115_vm14, %v1112_v19, -inf }
 0x3f1   :  { %1132 = vmax.xlane.f32.xlu1 %v1131_v21 }
 0x3f2   :  { %v1134_v22 = vsel %vm1115_vm14, %v1113_v20, -inf }
 0x3f3   :  { %1135 = vmax.xlane.f32.xlu0 %v1134_v22  ;;  %v1095_v23 = vpop.f32.mrb[12].mxu1 }
 0x3f4   :  { %v1106_v25 = vmul.f32 0.28867513, %v1095_v23  ;;  %v2720_v26 = vpop.f32.mrb[13].mxu1 }
 0x3f6   :  { %v1114_v27 = vadd.f32 %v1106_v25, %v489_v46 }
 0x3f7   :  { %v1118_v30 = vpop.xlane.xlu0 %1117 }
 0x3f8   :  { %v1137_v29 = vsel %vm1115_vm14, %v1114_v27, -inf  ;;  %v1140_v31 = vsub.f32 %v1107_v49, %v1118_v30 }
 0x3f9   :  { %1138 = vmax.xlane.f32.xlu1 %v1137_v29 }
 0x3fa   :  { %v1148_v33 = vmul.f32 1.442695, %v1140_v31 }
 0x3fc   :  { %3044 = vpow2.f32 %v1148_v33 }
 0x409   :  { %3001 = vrot.lane.b32.xlu0 %v3549_v60, %s3276_s3  ;;  %v3658_v60 = vpop.eup %3044 }
 0x40a   :  { %3006 = vrot.lane.b32.xlu1 %v3568_v7, %s3276_s3  ;;  %v1164_v7 = vsel %vm1115_vm14, %v3658_v60, 0.0 }
 0x40d   :  { %3021 = vrot.lane.b32.xlu0 %v3559_v3, %s3276_s3 }
 0x40e   :  { %3011 = vrot.lane.b32.xlu1 %v3570_v8, %s3276_s3 }
 0x412   :  { %3016 = vrot.lane.b32.xlu1 %v3578_v16, %s3276_s3 }
 0x416   :  { %3026 = vrot.lane.b32.xlu1 %v3576_v15, %s3276_s3 }
 0x42c   :  { %1165 = vadd.xlane.f32.xlu0 %v1164_v7 }
 0x46e   :  { %v1121_v3 = vpop.xlane.xlu1 %1120 }
 0x46f   :  { %v1141_v34 = vsub.f32 %v1108_v57, %v1121_v3 }
 0x470   :  { %v1124_v35 = vpop.xlane.xlu0 %1123 }
 0x471   :  { %v1150_v8 = vmul.f32 1.442695, %v1141_v34  ;;  %v1142_v37 = vsub.f32 %v1109_v59, %v1124_v35 }
 0x473   :  { %3046 = vpow2.f32 %v1150_v8  ;;  %v1152_v16 = vmul.f32 1.442695, %v1142_v37 }
 0x475   :  { %3048 = vpow2.f32 %v1152_v16 }
 0x476   :  { %v1127_v38 = vpop.xlane.xlu0 %1126 }
 0x477   :  { %v1143_v39 = vsub.f32 %v1110_v5, %v1127_v38 }
 0x479   :  { %v1154_v41 = vmul.f32 1.442695, %v1143_v39 }
 0x47a   :  { %v1130_v15 = vpop.xlane.xlu0 %1129 }
 0x47b   :  { %3050 = vpow2.f32 %v1154_v41  ;;  %v1144_v43 = vsub.f32 %v1111_v9, %v1130_v15 }
 0x47d   :  { %v3662_v45 = vpop.eup %3046  ;;  %v1156_v46 = vmul.f32 1.442695, %v1144_v43 }
 0x47e   :  { %v1133_v47 = vpop.xlane.xlu1 %1132  ;;  %v1167_v48 = vsel %vm1115_vm14, %v3662_v45, 0.0 }
 0x47f   :  { %v3666_v49 = vpop.eup %3048  ;;  %3052 = vpow2.f32 %v1156_v46  ;;  %v1145_v50 = vsub.f32 %v1112_v19, %v1133_v47  ;;  %1168 = vadd.xlane.f32.xlu1 %v1167_v48 }
 0x480   :  { %v1136_v51 = vpop.xlane.xlu0 %1135  ;;  %v1170_v44 = vsel %vm1115_vm14, %v3666_v49, 0.0 }
 0x481   :  { %v1146_v53 = vsub.f32 %v1113_v20, %v1136_v51  ;;  %v1158_v54 = vmul.f32 1.442695, %v1145_v50  ;;  %1171 = vadd.xlane.f32.xlu0 %v1170_v44 }
 0x483   :  { %v1160_v55 = vmul.f32 1.442695, %v1146_v53  ;;  %3054 = vpow2.f32 %v1158_v54 }
 0x484   :  { %v3002_v56 = vpop.permute.xlu0 %3001 }
 0x485   :  { %v3670_v57 = vpop.eup %3050  ;;  %3056 = vpow2.f32 %v1160_v55  ;;  %v3004_v58 = vunpack.i.h.bf16 %v3002_v56  ;;  %v3003_v59 = vunpack.i.l.bf16 %v3002_v56 }
 0x486   :  { %v1139_v61 = vpop.xlane.xlu1 %1138  ;;  %v1173_v62 = vsel %vm1115_vm14, %v3670_v57, 0.0 }
 0x487   :  { %v2883_v63 = vpack.c.bf16 %v3004_v58, %v3003_v59  ;;  %v1147_v0 = vsub.f32 %v1114_v27, %v1139_v61  ;;  %1174 = vadd.xlane.f32.xlu1 %v1173_v62 }
 0x488   :  { %v3022_v19 = vpop.permute.xlu0 %3021 }
 0x489   :  { %v3674_v1 = vpop.eup %3052  ;;  %v1162_v2 = vmul.f32 1.442695, %v1147_v0  ;;  %2884 = vmatpush3.bf16.msra.mxu0 %v2883_v63  ;;  %v3024_v3 = vunpack.i.h.bf16 %v3022_v19  ;;  %v3023_v34 = vunpack.i.l.bf16 %v3022_v19  ;;  %v1872_v19 = vld [vmem:[#allocation7 + $0x20] sm:$0xff] }
 0x48a   :  { %v3007_v4 = vpop.permute.xlu1 %3006  ;;  %v1176_v5 = vsel %vm1115_vm14, %v3674_v1, 0.0  ;;  %2888 = vmatprep.subr.bf16.mxu0 %v3270_v52 }
 0x48b   :  { %3058 = vpow2.f32 %v1162_v2  ;;  %v3009_v6 = vunpack.i.h.bf16 %v3007_v4  ;;  %v3008_v9 = vunpack.i.l.bf16 %v3007_v4  ;;  %1177 = vadd.xlane.f32.xlu0 %v1176_v5  ;;  %v2895_v39 = vpack.c.bf16 %v3024_v3, %v3023_v34  ;;  %v1868_v5 = vld [vmem:[#allocation7] sm:$0xff] }
 0x48d   :  { %v3679_v10 = vpop.eup %3054  ;;  %v2886_v11 = vpack.c.bf16 %v3009_v6, %v3008_v9  ;;  %v1869_v6 = vld [vmem:[#allocation7 + $0x8] sm:$0xff] }
 0x48e   :  { %v1179_v12 = vsel %vm1115_vm14, %v3679_v10, 0.0  ;;  %v3012_v21 = vpop.permute.xlu1 %3011  ;;  %v2906_v9 = vpack.c.bf16 %v1869_v6, %v1868_v5  ;;  %v2535_v5 = vld [vmem:[#allocation11] ss:$0 sm:$0xff] }
 0x48f   :  { %v3683_v13 = vpop.eup %3056  ;;  %1180 = vadd.xlane.f32.xlu1 %v1179_v12  ;;  %2887 = vmatpush3.bf16.msra.mxu1 %v2886_v11  ;;  %v3014_v22 = vunpack.i.h.bf16 %v3012_v21  ;;  %v3013_v23 = vunpack.i.l.bf16 %v3012_v21 }
 0x490   :  { %v1182_v14 = vsel %vm1115_vm14, %v3683_v13, 0.0  ;;  %2891 = vmatprep.subr.bf16.mxu1 %v3270_v52 }
 0x491   :  { %1183 = vadd.xlane.f32.xlu0 %v1182_v14  ;;  %v2889_v27 = vpack.c.bf16 %v3014_v22, %v3013_v23  ;;  %v1871_v14 = vld [vmem:[#allocation7 + $0x18] sm:$0xff] }
 0x495   :  { %v3688_v17 = vpop.eup %3058 }
 0x496   :  { %v1185_v18 = vsel %vm1115_vm14, %v3688_v17, 0.0 }
 0x497   :  { %1186 = vadd.xlane.f32.xlu1 %v1185_v18 }
 0x4a7   :  { %3031 = vrot.lane.b32.xlu0 %v3606_v28, %s3276_s3  ;;  %v3017_v28 = vpop.permute.xlu1 %3016 }
 0x4a8   :  { %3036 = vrot.lane.b32.xlu1 %v3590_v24, %s3276_s3  ;;  %v3019_v33 = vunpack.i.h.bf16 %v3017_v28  ;;  %v3018_v7 = vunpack.i.l.bf16 %v3017_v28 }
 0x4aa   :  { %v2892_v16 = vpack.c.bf16 %v3019_v33, %v3018_v7 }
 0x4ab   :  { %v3027_v24 = vpop.permute.xlu1 %3026 }
 0x4ac   :  { %v3029_v15 = vunpack.i.h.bf16 %v3027_v24  ;;  %v3028_v43 = vunpack.i.l.bf16 %v3027_v24 }
 0x4ae   :  { %v2898_v48 = vpack.c.bf16 %v3029_v15, %v3028_v43 }
 0x4b9   :  { %v1166_v20 = vpop.xlane.xlu0 %1165 }
 0x4ba   :  { %3060 = vrcp.f32 %v1166_v20  ;;  %v1873_v20 = vld [vmem:[#allocation7 + $0x28] sm:$0xff] }
 0x4bb   :  { %v2914_v22 = vpack.c.bf16 %v1873_v20, %v1872_v19 }
 0x4c4   :  { %v3061_v25 = vpop.eup %3060 }
 0x4c5   :  { %v1189_v26 = vmul.f32 %v3061_v25, %v3658_v60 }
 0x4c7   :  { %2726 = vmatmul.mubr.msk.f32.vlgmr.msra.gmra.mrb[8].mxu0 %vm1115_vm14, %v1189_v26 }
 0x4c8   :  { %2890 = vmatpush3.bf16.msra.mxu0 %v2889_v27  ;;  %2739 = vmatprep.mubr.msk.f32.mxu0 %vm3271_vm8, %v3272_v40 }
 0x4c9   :  { %2894 = vmatprep.subr.bf16.mxu0 %v3270_v52 }
 0x50c   :  { %v1169_v29 = vpop.xlane.xlu1 %1168 }
 0x50d   :  { %3062 = vrcp.f32 %v1169_v29 }
 0x50e   :  { %v1172_v30 = vpop.xlane.xlu0 %1171 }
 0x50f   :  { %3064 = vrcp.f32 %v1172_v30 }
 0x514   :  { %v1175_v31 = vpop.xlane.xlu1 %1174 }
 0x515   :  { %3066 = vrcp.f32 %v1175_v31 }
 0x517   :  { %v3063_v60 = vpop.eup %3062 }
 0x518   :  { %v1191_v35 = vmul.f32 %v3063_v60, %v3662_v45  ;;  %v1178_v8 = vpop.xlane.xlu0 %1177 }
 0x519   :  { %v3065_v37 = vpop.eup %3064  ;;  %3068 = vrcp.f32 %v1178_v8 }
 0x51a   :  { %v1193_v38 = vmul.f32 %v3065_v37, %v3666_v49  ;;  %2733 = vmatmul.mubr.msk.f32.vlgmr.msra.gmra.mrb[14].mxu1 %vm1115_vm14, %v1191_v35 }
 0x51b   :  { %2893 = vmatpush3.bf16.msra.mxu1 %v2892_v16  ;;  %2746 = vmatprep.mubr.msk.f32.mxu1 %vm3271_vm8, %v3272_v40 }
 0x51c   :  { %2740 = vmatmul.mubr.msk.f32.vlgmr.msra.gmra.mrb[10].mxu0 %vm1115_vm14, %v1193_v38  ;;  %v1181_v41 = vpop.xlane.xlu1 %1180  ;;  %2897 = vmatprep.subr.bf16.mxu1 %v3270_v52 }
 0x51d   :  { %2896 = vmatpush3.bf16.msra.mxu0 %v2895_v39  ;;  %3070 = vrcp.f32 %v1181_v41  ;;  %2753 = vmatprep.mubr.msk.f32.mxu0 %vm3271_vm8, %v3272_v40  ;;  %v2531_v41 = vld [vmem:[#allocation8] ss:$0 sm:$0xff] }
 0x51e   :  { %v1184_v45 = vpop.xlane.xlu0 %1183  ;;  %2900 = vmatprep.subr.bf16.mxu0 %v3270_v52 }
 0x51f   :  { %v3067_v46 = vpop.eup %3066  ;;  %3072 = vrcp.f32 %v1184_v45 }
 0x520   :  { %v1195_v47 = vmul.f32 %v3067_v46, %v3670_v57 }
 0x522   :  { %v3032_v49 = vpop.permute.xlu0 %3031  ;;  %2747 = vmatmul.mubr.msk.f32.vlgmr.msra.gmra.mrb[16].mxu1 %vm1115_vm14, %v1195_v47 }
 0x523   :  { %v3069_v50 = vpop.eup %3068  ;;  %v3034_v51 = vunpack.i.h.bf16 %v3032_v49  ;;  %v3033_v44 = vunpack.i.l.bf16 %v3032_v49  ;;  %2899 = vmatpush3.bf16.msra.mxu1 %v2898_v48  ;;  %2760 = vmatprep.mubr.msk.f32.mxu1 %vm3271_vm8, %v3272_v40 }
 0x524   :  { %v1197_v53 = vmul.f32 %v3069_v50, %v3674_v1  ;;  %v1187_v54 = vpop.xlane.xlu1 %1186  ;;  %2903 = vmatprep.subr.bf16.mxu1 %v3270_v52 }
 0x525   :  { %v2901_v55 = vpack.c.bf16 %v3034_v51, %v3033_v44  ;;  %3074 = vrcp.f32 %v1187_v54 }
 0x526   :  { %2754 = vmatmul.mubr.msk.f32.vlgmr.msra.gmra.mrb[12].mxu0 %vm1115_vm14, %v1197_v53 }
 0x527   :  { %v3071_v56 = vpop.eup %3070  ;;  %2902 = vmatpush3.bf16.msra.mxu0 %v2901_v55  ;;  %2767 = vmatprep.mubr.msk.f32.mxu0 %vm3271_vm8, %v3272_v40 }
 0x528   :  { %v1199_v57 = vmul.f32 %v3071_v56, %v3679_v10  ;;  %v3037_v58 = vpop.permute.xlu1 %3036  ;;  %2907 = vmatprep.subr.bf16.mxu0 %v2906_v9 }
 0x529   :  { %v3073_v59 = vpop.eup %3072  ;;  %v3039_v61 = vunpack.i.h.bf16 %v3037_v58  ;;  %v3038_v62 = vunpack.i.l.bf16 %v3037_v58 }
 0x52a   :  { %v1201_v63 = vmul.f32 %v3073_v59, %v3683_v13  ;;  %2761 = vmatmul.mubr.msk.f32.vlgmr.msra.gmra.mrb[18].mxu1 %vm1115_vm14, %v1199_v57  ;;  %v1870_v13 = vld [vmem:[#allocation7 + $0x10] sm:$0xff] }
 0x52b   :  { %v2904_v52 = vpack.c.bf16 %v3039_v61, %v3038_v62  ;;  %2774 = vmatprep.mubr.msk.f32.mxu1 %vm3271_vm8, %v3272_v40 }
 0x52c   :  { %2768 = vmatmul.mubr.msk.f32.vlgmr.msra.gmra.mrb[14].mxu0 %vm1115_vm14, %v1201_v63 }
 0x52d   :  { %2905 = vmatpush3.bf16.msra.mxu1 %v2904_v52  ;;  %2909 = vmatpush3.bf16.msra.mxu0 %v2906_v9 }
 0x52f   :  { %v3075_v0 = vpop.eup %3074 }
 0x530   :  { %v1203_v1 = vmul.f32 %v3075_v0, %v3688_v17  ;;  %v2910_v17 = vpack.c.bf16 %v1871_v14, %v1870_v13 }
 0x532   :  { %2775 = vmatmul.mubr.msk.f32.vlgmr.msra.gmra.mrb[20].mxu1 %vm1115_vm14, %v1203_v1  ;;  %2911 = vmatprep.subr.bf16.mxu0 %v2910_v17 }
 0x533   :  { %2913 = vmatpush3.bf16.msra.mxu0 %v2910_v17 }
 0x534   :  { %2915 = vmatprep.subr.bf16.mxu0 %v2914_v22 }
 0x537   :  { %2917 = vmatpush3.bf16.msra.mxu0 %v2914_v22 }
 0x59a   :  { %v1279_v2 = vpop.f32.mrb[8].mxu0 }
 0x59b   :  { %v2727_v4 = vpop.f32.mrb[9].mxu0 }
 0x5ed   :  { %v1358_v10 = vpop.f32.mrb[14].mxu1 }
 0x5ee   :  { %1837 = vrot.lane.b32.xlu0 %v1358_v10, %s3277_s30  ;;  %v2734_v11 = vpop.f32.mrb[15].mxu1 }
 0x5ef   :  { %v1437_v40 = vpop.f32.mrb[10].mxu0 }
 0x5f0   :  { %1841 = vrot.lane.b32.xlu1 %v1437_v40, %s3278_s6  ;;  %v2741_v12 = vpop.f32.mrb[11].mxu0 }
 0x5f5   :  { %v1516_v18 = vpop.f32.mrb[16].mxu1 }
 0x5f6   :  { %1845 = vrot.lane.b32.xlu1 %v1516_v18, %s3279_s17  ;;  %v2748_v21 = vpop.f32.mrb[17].mxu1 }
 0x5f9   :  { %v1595_v23 = vpop.f32.mrb[12].mxu0 }
 0x5fa   :  { %v2755_v25 = vpop.f32.mrb[13].mxu0 }
 0x5fd   :  { %v1674_v26 = vpop.f32.mrb[18].mxu1 }
 0x5fe   :  { %1854 = vrot.lane.b32.xlu0 %v1674_v26, %s3277_s30  ;;  %v2762_v27 = vpop.f32.mrb[19].mxu1 }
 0x5ff   :  { %v1753_v28 = vpop.f32.mrb[14].mxu0 }
 0x600   :  { %v2769_v24 = vpop.f32.mrb[15].mxu0 }
 0x601   :  { %v2035_v24 = vld [vmem:[%s3855_s10 + $0x8] sm:$0xff] }
 0x602   :  { %1858 = vrot.lane.b32.xlu0 %v1753_v28, %s3278_s6  ;;  %v2034_v28 = vld [vmem:[%s3855_s10] sm:$0xff] }
 0x605   :  { %v1832_v29 = vpop.f32.mrb[20].mxu1 }
 0x606   :  { %1862 = vrot.lane.b32.xlu1 %v1832_v29, %s3279_s17  ;;  %v2776_v30 = vpop.f32.mrb[21].mxu1  ;;  %v2036_v29 = vld [vmem:[%s3855_s10 + $0x10] sm:$0xff] }
 0x607   :  { %v2918_v30 = vpack.c.bf16 %v2035_v24, %v2034_v28 }
 0x609   :  { %2919 = vmatprep.subr.bf16.mxu1 %v2918_v30 }
 0x60a   :  { %2921 = vmatpush3.bf16.msra.mxu1 %v2918_v30 }
 0x660   :  { %v1838_v31 = vpop.permute.xlu0 %1837 }
 0x661   :  { %v1848_v7 = vsel %vm490_vm9, %v1279_v2, %v1838_v31  ;;  %v2534_v2 = vld [vmem:[#allocation10] ss:$0 sm:$0xff]  ;;  %v2037_v31 = vld [vmem:[%s3855_s10 + $0x18] sm:$0xff] }
 0x662   :  { %v1842_v33 = vpop.permute.xlu1 %1841 }
 0x663   :  { %v1850_v60 = vsel %vm1849_vm15, %v1848_v7, %v1842_v33  ;;  %v2922_v33 = vpack.c.bf16 %v2037_v31, %v2036_v29  ;;  %v2038_v7 = vld [vmem:[%s3855_s10 + $0x20] sm:$0xff] }
 0x665   :  { %2923 = vmatprep.subr.bf16.mxu1 %v2922_v33 }
 0x666   :  { %2925 = vmatpush3.bf16.msra.mxu1 %v2922_v33 }
 0x668   :  { %v1846_v3 = vpop.permute.xlu1 %1845 }
 0x669   :  { %v1852_v34 = vsel %vm1851_vm0, %v1850_v60, %v1846_v3  ;;  %v2039_v60 = vld [vmem:[%s3855_s10 + $0x28] sm:$0xff]  ;;  %s3281_s10 = smov 64  }
 0x66a   :  { %2789 = vmatprep.mubr.msk.f32.mxu0 %vm179_vm7, %v1852_v34  ;;  %v2926_v3 = vpack.c.bf16 %v2039_v60, %v2038_v7 }
 0x66c   :  { %2927 = vmatprep.subr.bf16.mxu1 %v2926_v3 }
 0x66d   :  { %2929 = vmatpush3.bf16.msra.mxu1 %v2926_v3 }
 0x670   :  { %v1855_v35 = vpop.permute.xlu0 %1854 }
 0x671   :  { %v1865_v37 = vsel %vm490_vm9, %v1595_v23, %v1855_v35 }
 0x674   :  { %v1859_v8 = vpop.permute.xlu0 %1858 }
 0x675   :  { %v1866_v16 = vsel %vm1849_vm15, %v1865_v37, %v1859_v8 }
 0x678   :  { %v1863_v38 = vpop.permute.xlu1 %1862 }
 0x679   :  { %v1867_v39 = vsel %vm1851_vm0, %v1866_v16, %v1863_v38 }
 0x67a   :  { %2790 = vmatmul.mubr.msk.f32.vlgmr.msra.gmra.mrb[16].mxu0 %vm179_vm7, %v1867_v39 }
 0x74d   :  { %v2791_v15 = vpop.f32.mrb[16].mxu0 }
 0x74e   :  { %v1959_v43 = vadd.f32 %v2791_v15, %v2531_v41  ;;  %v1953_v45 = vpop.f32.mrb[17].mxu0 }
 0x74f   :  { %v1954_v46 = vadd.f32 %v2531_v41, %v1953_v45 }
 0x750   :  { %v1965_v47 = vsel %vm179_vm7, %v1959_v43, 0.0 }
 0x751   :  { %1966 = vadd.xlane.f32.xlu1 %v1965_v47  ;;  %v1962_v48 = vsel %vm179_vm7, %v1954_v46, 0.0 }
 0x752   :  { %1963 = vadd.xlane.f32.xlu0 %v1962_v48 }
 0x7de   :  { %v1967_v49 = vpop.xlane.xlu1 %1966 }
 0x7df   :  { %v1969_v50 = vmul.f32 0.020833334, %v1967_v49  ;;  %v1964_v51 = vpop.xlane.xlu0 %1963 }
 0x7e0   :  { %v1968_v44 = vmul.f32 0.020833334, %v1964_v51 }
 0x7e1   :  { %v1971_v53 = vsub.f32 %v1959_v43, %v1969_v50 }
 0x7e2   :  { %v1970_v54 = vsub.f32 %v1954_v46, %v1968_v44 }
 0x7e3   :  { %v1973_v57 = vmul.f32 %v1971_v53, %v1971_v53 }
 0x7e4   :  { %v1972_v55 = vmul.f32 %v1970_v54, %v1970_v54 }
 0x7e5   :  { %v1977_v58 = vsel %vm179_vm7, %v1973_v57, 0.0 }
 0x7e6   :  { %v1974_v56 = vsel %vm179_vm7, %v1972_v55, 0.0 }
 0x7e7   :  { %1975 = vadd.xlane.f32.xlu0 %v1974_v56 }
 0x7eb   :  { %1978 = vadd.xlane.f32.xlu0 %v1977_v58 }
 0x874   :  { %v1976_v59 = vpop.xlane.xlu0 %1975 }
 0x875   :  { %v1980_v61 = vmul.f32 0.020833334, %v1976_v59 }
 0x877   :  { %v1982_v62 = vadd.f32 1e-05, %v1980_v61 }
 0x878   :  { %v1979_v63 = vpop.xlane.xlu0 %1978 }
 0x879   :  { %3076 = vrsqrt.f32 %v1982_v62  ;;  %v1981_v52 = vmul.f32 0.020833334, %v1979_v63 }
 0x87b   :  { %v1983_v0 = vadd.f32 1e-05, %v1981_v52 }
 0x87d   :  { %3078 = vrsqrt.f32 %v1983_v0 }
 0x883   :  { %v3077_v1 = vpop.eup %3076 }
 0x884   :  { %v1986_v4 = vmul.f32 %v3077_v1, %v1970_v54 }
 0x886   :  { %v1995_v6 = vmul.f32 %v2534_v2, %v1986_v4 }
 0x887   :  { %v3079_v9 = vpop.eup %3078 }
 0x888   :  { %v2004_v10 = vadd.f32 %v2535_v5, %v1995_v6  ;;  %v1987_v11 = vmul.f32 %v3079_v9, %v1971_v53 }
 0x88a   :  { %v3737_v40 = vadd.f32 %v2004_v10, %v3453_v32  ;;  %v1996_v12 = vmul.f32 %v2534_v2, %v1987_v11 }
 0x88c   :  { %v2008_v13 = vsel %vm179_vm7, %v3737_v40, 0.0  ;;  %v2005_v14 = vadd.f32 %v2535_v5, %v1996_v12 }
 0x88d   :  { %2009 = vadd.xlane.f32.xlu0 %v2008_v13 }
 0x88e   :  { %v3742_v17 = vadd.f32 %v2005_v14, %v3460_v36 }
 0x890   :  { %v2011_v18 = vsel %vm179_vm7, %v3742_v17, 0.0 }
 0x891   :  { %2012 = vadd.xlane.f32.xlu1 %v2011_v18 }
 0x91a   :  { %v2010_v19 = vpop.xlane.xlu0 %2009 }
 0x91b   :  { %v2014_v20 = vmul.f32 0.020833334, %v2010_v19 }
 0x91d   :  { %v2016_v21 = vsub.f32 %v3737_v40, %v2014_v20 }
 0x91e   :  { %v2013_v22 = vpop.xlane.xlu1 %2012 }
 0x91f   :  { %v2015_v32 = vmul.f32 0.020833334, %v2013_v22  ;;  %v2018_v23 = vmul.f32 %v2016_v21, %v2016_v21 }
 0x921   :  { %v2017_v25 = vsub.f32 %v3742_v17, %v2015_v32  ;;  %v2020_v26 = vsel %vm179_vm7, %v2018_v23, 0.0 }
 0x922   :  { %2021 = vadd.xlane.f32.xlu0 %v2020_v26 }
 0x923   :  { %v2019_v27 = vmul.f32 %v2017_v25, %v2017_v25 }
 0x925   :  { %v2023_v36 = vsel %vm179_vm7, %v2019_v27, 0.0 }
 0x926   :  { %2024 = vadd.xlane.f32.xlu1 %v2023_v36  ;;  %v3280_v36 = vmov -1.0  }
 0x9af   :  { %v2022_v34 = vpop.xlane.xlu0 %2021 }
 0x9b0   :  { %v2026_v35 = vmul.f32 0.020833334, %v2022_v34 }
 0x9b2   :  { %v2028_v8 = vadd.f32 1e-05, %v2026_v35 }
 0x9b3   :  { %v2025_v37 = vpop.xlane.xlu1 %2024 }
 0x9b4   :  { %3080 = vrsqrt.f32 %v2028_v8  ;;  %v2027_v16 = vmul.f32 0.020833334, %v2025_v37 }
 0x9b6   :  { %v2029_v38 = vadd.f32 1e-05, %v2027_v16 }
 0x9b8   :  { %3082 = vrsqrt.f32 %v2029_v38 }
 0x9be   :  { %v3081_v39 = vpop.eup %3080 }
 0x9bf   :  { %v2032_v41 = vmul.f32 %v3081_v39, %v2016_v21 }
 0x9c1   :  { %2804 = vmatprep.mubr.msk.f32.mxu1 %vm179_vm7, %v2032_v41 }
 0x9c2   :  { %v3083_v15 = vpop.eup %3082 }
 0x9c3   :  { %v2033_v43 = vmul.f32 %v3083_v15, %v2017_v25 }
 0x9c5   :  { %2805 = vmatmul.mubr.msk.f32.vlgmr.msra.gmra.mrb[22].mxu1 %vm179_vm7, %v2033_v43 }
 0xa98   :  { %v3770_v45 = vpop.f32.mrb[22].mxu1 }
 0xa99   :  { %v2124_v46 = vmul.f32 0.70710677, %v3770_v45  ;;  %v3773_v47 = vpop.f32.mrb[23].mxu1  ;;  %v2122_v33 = vmul.f32 0.5, %v3770_v45 }
 0xa9a   :  { %v2123_v48 = vmul.f32 0.70710677, %v3773_v47  ;;  %v2121_v60 = vmul.f32 0.5, %v3773_v47 }
 0xa9b   :  { %v2130_v49 = vand.u32 2147483647, %v2124_v46  ;;  %vm2126_vm1 = vcmp.ge.f32.partialorder %v2124_v46, 0.0 }
 0xa9c   :  { %v2129_v50 = vand.u32 2147483647, %v2123_v48  ;;  %vm2125_vm2 = vcmp.ge.f32.partialorder %v2123_v48, 0.0  ;;  %v2128_v28 = vsel %vm2126_vm1, 1.0, %v3280_v36 }
 0xa9d   :  { %v2132_v51 = vmul.f32 0.3275911, %v2130_v49  ;;  %v2158_v55 = vsub.f32 0.0, %v2130_v49  ;;  %v2127_v29 = vsel %vm2125_vm2, 1.0, %v3280_v36 }
 0xa9e   :  { %v2131_v44 = vmul.f32 0.3275911, %v2129_v50  ;;  %v2157_v56 = vsub.f32 0.0, %v2129_v50 }
 0xa9f   :  { %v2134_v53 = vadd.f32 1.0, %v2132_v51  ;;  %v2160_v58 = vmul.f32 %v2158_v55, %v2130_v49 }
 0xaa0   :  { %v2133_v54 = vadd.f32 1.0, %v2131_v44  ;;  %v2159_v61 = vmul.f32 %v2157_v56, %v2129_v50  ;;  %v2215_v56 = vld [vmem:[%s3856_s11 + $0x10] sm:$0xff] }
 0xaa1   :  { %3084 = vrcp.f32 %v2134_v53  ;;  %v2163_v0 = vmul.f32 1.442695, %v2160_v58 }
 0xaa2   :  { %3086 = vrcp.f32 %v2133_v54  ;;  %v2161_v2 = vmul.f32 1.442695, %v2159_v61  ;;  %v2214_v54 = vld [vmem:[%s3856_s11 + $0x8] sm:$0xff] }
 0xaa3   :  { %3088 = vpow2.f32 %v2163_v0  ;;  %v2218_v61 = vld [vmem:[%s3856_s11 + $0x28] sm:$0xff] }
 0xaa4   :  { %3090 = vpow2.f32 %v2161_v2 }
 0xaab   :  { %v3085_v57 = vpop.eup %3084 }
 0xaac   :  { %v3087_v59 = vpop.eup %3086  ;;  %v2140_v62 = vmul.f32 1.0614054, %v3085_v57 }
 0xaad   :  { %v2139_v63 = vmul.f32 1.0614054, %v3087_v59  ;;  %v3089_v22 = vpop.eup %3088 }
 0xaae   :  { %v2142_v52 = vadd.f32 -1.4531521, %v2140_v62  ;;  %v3091_v23 = vpop.eup %3090 }
 0xaaf   :  { %v2141_v1 = vadd.f32 -1.4531521, %v2139_v63  ;;  %v2219_v63 = vld [vmem:[%s3856_s11 + $0x30] sm:$0xff] }
 0xab0   :  { %v2144_v4 = vmul.f32 %v3085_v57, %v2142_v52  ;;  %v2220_v52 = vld [vmem:[%s3856_s11 + $0x38] sm:$0xff] }
 0xab1   :  { %v2143_v5 = vmul.f32 %v3087_v59, %v2141_v1  ;;  %v2942_v0 = vpack.c.bf16 %v2220_v52, %v2219_v63 }
 0xab2   :  { %v2146_v6 = vadd.f32 1.4214138, %v2144_v4 }
 0xab3   :  { %v2145_v9 = vadd.f32 1.4214138, %v2143_v5 }
 0xab4   :  { %v2148_v10 = vmul.f32 %v3085_v57, %v2146_v6 }
 0xab5   :  { %v2147_v11 = vmul.f32 %v3087_v59, %v2145_v9 }
 0xab6   :  { %v2150_v12 = vadd.f32 -0.28449672, %v2148_v10 }
 0xab7   :  { %v2149_v13 = vadd.f32 -0.28449672, %v2147_v11 }
 0xab8   :  { %v2152_v14 = vmul.f32 %v3085_v57, %v2150_v12 }
 0xab9   :  { %v2151_v18 = vmul.f32 %v3087_v59, %v2149_v13 }
 0xaba   :  { %v2154_v19 = vadd.f32 0.2548296, %v2152_v14  ;;  %v3282_v14 = vmov 1966171168  }
 0xabb   :  { %v2153_v20 = vadd.f32 0.2548296, %v2151_v18  ;;  %v2307_v18 = vunpack.c.l.s4 %v3282_v14 }
 0xabc   :  { %v2156_v21 = vmul.f32 %v3085_v57, %v2154_v19  ;;  %v2216_v57 = vld [vmem:[%s3856_s11 + $0x18] sm:$0xff] }
 0xabd   :  { %v2155_v32 = vmul.f32 %v3087_v59, %v2153_v20  ;;  %v2934_v58 = vpack.c.bf16 %v2216_v57, %v2215_v56  ;;  %v2217_v59 = vld [vmem:[%s3856_s11 + $0x20] sm:$0xff]  ;;  %v2308_v19 = vunpack.c.0.s8 %v2307_v18 }
 0xabe   :  { %v2166_v25 = vmul.f32 %v3089_v22, %v2156_v21  ;;  %v2938_v62 = vpack.c.bf16 %v2218_v61, %v2217_v59 }
 0xabf   :  { %v2165_v26 = vmul.f32 %v3091_v23, %v2155_v32  ;;  %v2311_v20 = vsub.s32 %v2308_v19, %v3634_v42 }
 0xac0   :  { %v2168_v27 = vsub.f32 1.0, %v2166_v25 }
 0xac1   :  { %v2167_v24 = vsub.f32 1.0, %v2165_v26 }
 0xac2   :  { %v2170_v30 = vmul.f32 %v2168_v27, %v2128_v28  ;;  %v2414_v27 = vsub.s32 0, %v3634_v42 }
 0xac3   :  { %v2169_v31 = vmul.f32 %v2167_v24, %v2127_v29 }
 0xac4   :  { %v2172_v7 = vadd.f32 1.0, %v2170_v30 }
 0xac5   :  { %v2171_v3 = vadd.f32 1.0, %v2169_v31 }
 0xac6   :  { %v2174_v34 = vmul.f32 %v2172_v7, %v2122_v33 }
 0xac7   :  { %v2173_v35 = vmul.f32 %v2171_v3, %v2121_v60 }
 0xac8   :  { %2179 = vrot.lane.b32.xlu1 %v2174_v34, %s3281_s10 }
 0xac9   :  { %2177 = vrot.lane.b32.xlu0 %v2173_v35, %s3281_s10 }
 0xb3a   :  { %v2180_v8 = vpop.permute.xlu1 %2179 }
 0xb3b   :  { %v2184_v37 = vmul.f32 %v3770_v45, %v2180_v8  ;;  %v2178_v16 = vpop.permute.xlu0 %2177 }
 0xb3c   :  { %v2183_v38 = vmul.f32 %v2178_v16, %v3773_v47  ;;  %v2213_v47 = vld [vmem:[%s3856_s11] sm:$0xff]  ;;  %s3283_s11 = smov [#allocation13]  }
 0xb3d   :  { %v2189_v39 = vsel %vm2185_vm3, %v2184_v37, 0.0  ;;  %v2930_v55 = vpack.c.bf16 %v2214_v54, %v2213_v47  ;;  %s2475_s19 = sshll.u32 %s3283_s11, 4  ;;  %s2476_s19 = int_to_ptr.vmem [resolvable:$true] %s2475_s19 }
 0xb3e   :  { %2190 = vadd.xlane.f32.xlu0 %v2189_v39  ;;  %v2186_v41 = vsel %vm2185_vm3, %v2183_v38, 0.0  ;;  %s3228_s0 = scalar_lea.vmem %s2476_s19, 256  ;;  %p3233_p7 = scmp.lt.s32.totalorder %s2476_s19, %s2476_s19 }
 0xb3f   :  { %2187 = vadd.xlane.f32.xlu1 %v2186_v41  ;;  %2931 = vmatprep.subr.bf16.mxu0 %v2930_v55  ;;  %p3229_p6 = scmp.ne.s32.totalorder %s2476_s19, %s3228_s0  ;;  %p3234_p8 = scmp.lt.s32.totalorder %s3228_s0, %s3228_s0 }
 0xb40   :  { %2933 = vmatpush3.bf16.msra.mxu0 %v2930_v55 }
 0xb41   :  { %2935 = vmatprep.subr.bf16.mxu0 %v2934_v58  ;;  %p3235_p9 = por %p3234_p8, %p3233_p7 }
 0xb43   :  { %p3236_p10 = pnand %p3235_p9, %p3229_p6 }
 0xb44   :  { %2937 = vmatpush3.bf16.msra.mxu0 %v2934_v58 }
 0xb45   :  { %2939 = vmatprep.subr.bf16.mxu0 %v2938_v62 }
 0xb48   :  { %2941 = vmatpush3.bf16.msra.mxu0 %v2938_v62 }
 0xb49   :  { %2943 = vmatprep.subr.bf16.mxu0 %v2942_v0 }
 0xb4c   :  { %2945 = vmatpush3.bf16.msra.mxu0 %v2942_v0 }
 0xbcb   :  { %v2191_v15 = vpop.xlane.xlu0 %2190 }
 0xbcc   :  { %v2194_v43 = vmul.f32 0.015625, %v2191_v15  ;;  %v2188_v46 = vpop.xlane.xlu1 %2187 }
 0xbcd   :  { %v2193_v48 = vmul.f32 0.015625, %v2188_v46 }
 0xbce   :  { %v2196_v49 = vsub.f32 %v2184_v37, %v2194_v43 }
 0xbcf   :  { %v2195_v50 = vsub.f32 %v2183_v38, %v2193_v48 }
 0xbd0   :  { %v2198_v51 = vmul.f32 %v2196_v49, %v2196_v49 }
 0xbd1   :  { %v2197_v44 = vmul.f32 %v2195_v50, %v2195_v50 }
 0xbd2   :  { %v2202_v53 = vsel %vm2185_vm3, %v2198_v51, 0.0 }
 0xbd3   :  { %2203 = vadd.xlane.f32.xlu1 %v2202_v53  ;;  %v2199_v45 = vsel %vm2185_vm3, %v2197_v44, 0.0 }
 0xbd4   :  { %2200 = vadd.xlane.f32.xlu0 %v2199_v45 }
 0xc60   :  { %v2204_v1 = vpop.xlane.xlu1 %2203 }
 0xc61   :  { %v2206_v2 = vmul.f32 0.015625, %v2204_v1  ;;  %v2201_v4 = vpop.xlane.xlu0 %2200 }
 0xc62   :  { %v2205_v5 = vmul.f32 0.015625, %v2201_v4 }
 0xc63   :  { %v2208_v6 = vadd.f32 1e-05, %v2206_v2 }
 0xc64   :  { %v2207_v9 = vadd.f32 1e-05, %v2205_v5 }
 0xc65   :  { %3092 = vrsqrt.f32 %v2208_v6 }
 0xc66   :  { %3094 = vrsqrt.f32 %v2207_v9 }
 0xc6f   :  { %v3093_v10 = vpop.eup %3092 }
 0xc70   :  { %v3095_v11 = vpop.eup %3094  ;;  %v2212_v13 = vmul.f32 %v3093_v10, %v2196_v49 }
 0xc71   :  { %v2211_v12 = vmul.f32 %v3095_v11, %v2195_v50 }
 0xc73   :  { %2823 = vmatprep.mubr.msk.f32.mxu0 %vm2185_vm3, %v2211_v12 }
 0xc74   :  { %2824 = vmatmul.mubr.msk.f32.vlgmr.msra.gmra.mrb[18].mxu0 %vm2185_vm3, %v2212_v13 }
 0xd47   :  { %v2825_v21 = vpop.f32.mrb[18].mxu0 }
 0xd48   :  { %v2303_v22 = vadd.f32 %v2825_v21, %v3742_v17  ;;  %v2293_v32 = vpop.f32.mrb[19].mxu0 }
 0xd49   :  { %v2302_v23 = vadd.f32 %v2293_v32, %v3737_v40 }
 0xd4a   :  { %v2363_v25 = vcombine.high %v2303_v22, %v2303_v22  ;;  %v2370_v26 = vrot.slane %v2303_v22, %v2311_v20 }
 0xd4b   :  { %v2305_v36 = vcombine.high %v2302_v23, %v2302_v23  ;;  %v2312_v28 = vrot.slane %v2302_v23, %v2311_v20 }
 0xd4c   :  { %v2377_v24 = vrot.slane %v2363_v25, %v2311_v20  ;;  %v2378_v29 = vcombine.high %v2370_v26, %v2370_v26  ;;  %v2386_v30 = vrot.slane %v2370_v26, %v2311_v20 }
 0xd4d   :  { %v2319_v31 = vrot.slane %v2305_v36, %v2311_v20  ;;  %v2320_v33 = vcombine.high %v2312_v28, %v2312_v28  ;;  %v2328_v7 = vrot.slane %v2312_v28, %v2311_v20 }
 0xd4e   :  { %v2379_v60 = vcombine.high %v2377_v24, %v2377_v24  ;;  %v2393_v3 = vrot.slane %v2377_v24, %v2311_v20  ;;  %v2400_v17 = vrot.slane %v2378_v29, %v2311_v20  ;;  %v2408_v34 = vcombine.high %v2386_v30, %v2386_v30 }
 0xd4f   :  { %v2415_v35 = vrot.slane %v2386_v30, %v2414_v27  ;;  %v2321_v40 = vcombine.high %v2319_v31, %v2319_v31  ;;  %v2335_v8 = vrot.slane %v2319_v31, %v2311_v20  ;;  %v2342_v37 = vrot.slane %v2320_v33, %v2311_v20 }
 0xd50   :  { %v2407_v16 = vrot.slane %v2379_v60, %v2311_v20  ;;  %v2409_v42 = vcombine.high %v2393_v3, %v2393_v3  ;;  %v2410_v38 = vcombine.high %v2400_v17, %v2400_v17  ;;  %v2419_v39 = vrot.slane %v2400_v17, %v2414_v27 }
 0xd51   :  { %v2423_v41 = vrot.slane %v2408_v34, %v2414_v27  ;;  %v2431_v15 = vrot.slane %v2393_v3, %v2414_v27  ;;  %v2349_v43 = vrot.slane %v2321_v40, %v2311_v20  ;;  %v2350_v46 = vcombine.high %v2328_v7, %v2328_v7 }
 0xd52   :  { %v2411_v48 = vcombine.high %v2407_v16, %v2407_v16  ;;  %v2427_v49 = vrot.slane %v2410_v38, %v2414_v27  ;;  %v2435_v50 = vrot.slane %v2407_v16, %v2414_v27  ;;  %v2439_v51 = vrot.slane %v2409_v42, %v2414_v27 }
 0xd53   :  { %v2351_v44 = vcombine.high %v2335_v8, %v2335_v8  ;;  %v2352_v53 = vcombine.high %v2342_v37, %v2342_v37  ;;  %v2353_v45 = vcombine.high %v2349_v43, %v2349_v43  ;;  %v2453_v47 = vsel %vm2452_vm4, %v2328_v7, %v2415_v35 }
 0xd54   :  { %v2443_v54 = vrot.slane %v2411_v48, %v2414_v27  ;;  %v2454_v55 = vsel %vm2452_vm4, %v2342_v37, %v2419_v39  ;;  %v2455_v56 = vsel %vm2452_vm4, %v2350_v46, %v2423_v41  ;;  %v2457_v57 = vsel %vm2452_vm4, %v2335_v8, %v2431_v15  ;;  %2462 = vst.msk [vmem:[#allocation13] sm:$0x3] %vm2461_vm5, %v2453_v47 }
 0xd55   :  { %v2456_v58 = vsel %vm2452_vm4, %v2352_v53, %v2427_v49  ;;  %v2458_v59 = vsel %vm2452_vm4, %v2349_v43, %v2435_v50  ;;  %v2459_v61 = vsel %vm2452_vm4, %v2351_v44, %v2439_v51  ;;  %2463 = vst.msk [vmem:[#allocation13 + $0x2] sm:$0x3] %vm2461_vm5, %v2454_v55  ;;  %2464 = vst.msk [vmem:[#allocation13 + $0x4] sm:$0x3] %vm2461_vm5, %v2455_v56 }
 0xd56   :  { %2466 = vst.msk [vmem:[#allocation13 + $0x8] sm:$0x3] %vm2461_vm5, %v2457_v57  ;;  %v2460_v62 = vsel %vm2452_vm4, %v2353_v45, %v2443_v54  ;;  %2465 = vst.msk [vmem:[#allocation13 + $0x6] sm:$0x3] %vm2461_vm5, %v2456_v58 }
 0xd57   :  { %2467 = vst.msk [vmem:[#allocation13 + $0xa] sm:$0x3] %vm2461_vm5, %v2458_v59  ;;  %2468 = vst.msk [vmem:[#allocation13 + $0xc] sm:$0x3] %vm2461_vm5, %v2459_v61 }
 0xd58   :  { %2469 = vst.msk [vmem:[#allocation13 + $0xe] sm:$0x3] %vm2461_vm5, %v2460_v62 }
 0xd59   :  { %3239 = shalt.err (!%p3236_p10)
}
 0xd5a   :  { %s3240_s21 = scalar_lea.hbm %s3857_s12, 256 }
 0xd5b   :  { %p3241_p11 = scmp.ne.s32.totalorder %s3857_s12, %s3240_s21  ;;  %p3244_p12 = scmp.lt.u32.totalorder %s3240_s21, %s3857_s12 }
 0xd5d   :  { %p3246_p13 = pnand %p3244_p12, %p3241_p11 }
 0xd5f   :  { %3249 = shalt.err (!%p3246_p13)
}
 0xd60   :  { %2481 = dma.vmem_to_hbm [thread:$0]  %s2476_s19, 256, %s3857_s12, [#allocation4], %s3262_s15, %s3262_s15, %s3263_s16  }
 0xd61   :  { %3258 = dma.done.wait [#allocation4], 256  }
 0xd62   :  { %3259 = vsyncadd [#allocation4], 4294967040 }
 0xd63   :  { %2485 = vsyncpa [#allocation3], 1 }
 0xd64   :  { %2486 = vsyncpa [#allocation6], 1 }
 0xd65   :  { %2487 = vsyncpa [#allocation9], 1 }
 0xd66   :  { %2488 = vsyncpa [#allocation12], 1 }
 0xd67   :  { %2489 = vsyncpa [#allocation4], 1 }

</bundles_post_ra>
